<compile_context>
chip_gen: v5e
topology: v5e:2x2
jax: 0.10.0
libtpu: 0.0.40
codegen_flags: <defaults>
</compile_context>

<pallas_src>
import math

import jax
import jax.numpy as jnp
from jax.experimental import pallas as pl

# ---------------- problem sizes (small, consistent with the module) ----------
N, L, E, H = 2, 8, 32, 4          # batch, seq len, embed_size, heads
D = E // H                        # head_dim
FE = 2                            # forward_expansion
HID = FE * E                      # ff hidden dim
NL = N * L
NH = N * H
NEG = -1e20
EPS = 1e-5                        # nn.LayerNorm default eps
SCALE = 1.0 / math.sqrt(E)

# column offsets inside the fused input-projection slab (E, 5*E) = (32, 160)
#   cols [0, 3E)   : block-diag [Wq1.T | Wk1.T | Wv1.T]   (used by the x rows)
#   cols [3E, 4E)  : block-diag Wv2.T                     (used by the value rows)
#   cols [4E, 5E)  : block-diag Wk2.T                     (used by the key rows)
_C_QKV1 = 0
_C_V2 = 3 * E
_C_K2 = 4 * E
PROJ_COLS = 5 * E


# ---------------- in-kernel building blocks ----------------------------------
def _to_heads(x):
    # (NL, E) -> (N*H, L, D); only lane slices + leading-dim reshapes/stack.
    parts = [x[:, h * D:(h + 1) * D].reshape(N, L, D) for h in range(H)]
    return jnp.stack(parts, axis=1).reshape(NH, L, D)


def _from_heads(o):
    # (N*H, L, D) -> (NL, E); heads concatenated along lanes (index h*D + d).
    o4 = o.reshape(N, H, L, D)
    return jnp.concatenate([o4[:, h].reshape(NL, D) for h in range(H)], axis=-1)


def _mask_bias(mask_i32):
    # int {0,1} (N, L, L) -> additive f32 bias (N*H, L, L): 0 keep, -1e20 drop.
    mb = (mask_i32.astype(jnp.float32) - 1.0) * 1e20
    return jnp.broadcast_to(mb[:, None], (N, H, L, L)).reshape(NH, L, L)


def _attention(q, k, v, mask_bias, wo_t, bo):
    """SelfAttention core on already-projected q/k/v, (NL, E) each."""
    qh, kh, vh = _to_heads(q), _to_heads(k), _to_heads(v)            # (NH, L, D)
    e = jnp.einsum('bqd,bkd->bqk', qh, kh,
                   preferred_element_type=jnp.float32)               # (NH, L, L)
    e = e * SCALE + mask_bias                                        # fused mask
    m = jnp.max(e, axis=-1, keepdims=True)
    p = jnp.exp(e - m)
    a = p / jnp.sum(p, axis=-1, keepdims=True)                       # exact divide
    o = jnp.einsum('bqk,bkd->bqd', a, vh,
                   preferred_element_type=jnp.float32)               # (NH, L, D)
    return jnp.dot(_from_heads(o), wo_t,
                   preferred_element_type=jnp.float32) + bo          # (NL, E)


def _layer_norm(x, g, b):
    mu = jnp.mean(x, axis=-1, keepdims=True)
    var = jnp.mean((x - mu) ** 2, axis=-1, keepdims=True)
    return (x - mu) * jax.lax.rsqrt(var + EPS) * g + b


# ---------------- the fused kernel --------------------------------------------
def decoder_block_kernel(x_ref, val_ref, key_ref, trg_mask_ref, src_mask_ref,
                         w_proj_ref, w_o1_ref, w_q2_ref, w_o2_ref,
                         w_ff1_ref, w_ff2_ref, vec_ref, out_ref):
    x = x_ref[...].reshape(NL, E)
    val = val_ref[...].reshape(NL, E)
    key = key_ref[...].reshape(NL, E)

    V = vec_ref[...]                     # (10, 64) packed biases / LN params
    bo1, g0, b0 = V[0:1, :E], V[1:2, :E], V[2:3, :E]
    bo2, g1, b1 = V[3:4, :E], V[4:5, :E], V[5:6, :E]
    bff1, bff2 = V[6:7, :HID], V[7:8, :E]
    g2, b2 = V[8:9, :E], V[9:10, :E]

    # additive mask biases built in-kernel from the raw int masks (cheap VPU work
    # hidden under the projection matmul below).
    trg_bias = _mask_bias(trg_mask_ref[...])
    src_bias = _mask_bias(src_mask_ref[...])

    # ---- ONE fused matmul for every projection that depends only on inputs ----
    A = jnp.concatenate([x, val, key], axis=0)                        # (3*NL, E)
    R = jnp.dot(A, w_proj_ref[...],
                preferred_element_type=jnp.float32)                   # (48, 160)
    qkv1 = R[:NL, _C_QKV1:_C_QKV1 + 3 * E]          # x rows    -> fused QKV (att1)
    v2 = R[NL:2 * NL, _C_V2:_C_V2 + E]              # value rows -> V of att2
    k2 = R[2 * NL:, _C_K2:_C_K2 + E]                # key rows   -> K of att2

    # ---- DecoderBlock: masked self-attention on x ----
    att1 = _attention(qkv1[:, :E], qkv1[:, E:2 * E], qkv1[:, 2 * E:],
                      trg_bias, w_o1_ref[...], bo1)
    query = _layer_norm(att1 + x, g0, b0)                             # dropout = id

    # ---- TransformerBlock: cross-attention (only Q waits on `query`) ----
    q2 = jnp.dot(query, w_q2_ref[...], preferred_element_type=jnp.float32)
    att2 = _attention(q2, k2, v2, src_bias, w_o2_ref[...], bo2)
    x2 = _layer_norm(att2 + query, g1, b1)

    # ---- feed forward: Linear -> ReLU -> Linear (both plain NN matmuls) ----
    h1 = jnp.maximum(
        jnp.dot(x2, w_ff1_ref[...], preferred_element_type=jnp.float32) + bff1, 0.0)
    ff = jnp.dot(h1, w_ff2_ref[...], preferred_element_type=jnp.float32) + bff2
    y = _layer_norm(ff + x2, g2, b2)

    out_ref[...] = y.reshape(N, L, E)    # leading-dim-only reshape (safe)


# ---------------- one-time parameter packing (outside the per-call path) ------
def pack_decoder_block_params(P):
    """Runs ONCE at parameter-load time; nothing here is on the per-step path."""
    eye_h = jnp.eye(H, dtype=jnp.float32)
    bd = lambda w: jnp.kron(eye_h, w.T).astype(jnp.float32)   # (D,D) -> block-diag (E,E)

    w_proj = jnp.concatenate(
        [bd(P['Wq1']), bd(P['Wk1']), bd(P['Wv1']),             # cols 0:96
         bd(P['Wv2']),                                         # cols 96:128
         bd(P['Wk2'])], axis=1)                                # cols 128:160

    def row(v):
        return jnp.pad(v.astype(jnp.float32), (0, HID - v.shape[0]))[None, :]
    vecs = jnp.concatenate(
        [row(P['bo1']), row(P['g0']), row(P['b0']),
         row(P['bo2']), row(P['g1']), row(P['b1']),
         row(P['bff1']), row(P['bff2']), row(P['g2']), row(P['b2'])],
        axis=0)                                                # (10, 64)

    return {
        'w_proj': w_proj,                                      # (E, 160)
        'w_o1': P['Wo1'].T.astype(jnp.float32),                # (E, E)
        'w_q2': bd(P['Wq2']),                                  # (E, E)
        'w_o2': P['Wo2'].T.astype(jnp.float32),                # (E, E)
        'w_ff1': P['Wff1'].T.astype(jnp.float32),              # (E, HID)
        'w_ff2': P['Wff2'].T.astype(jnp.float32),              # (HID, E) pre-transposed
        'vecs': vecs,                                          # (10, 64)
    }


# ---------------- wrapper: the jitted path is ONLY the pallas_call -------------
@jax.jit
def decoder_block(x, value, key, trg_mask, src_mask, packed):
    # Gridless call: the whole problem (< 0.5 MiB) lives in VMEM in one shot.
    return pl.pallas_call(
        decoder_block_kernel,
        out_shape=jax.ShapeDtypeStruct((N, L, E), jnp.float32),
    )(x, value, key, trg_mask, src_mask,
      packed['w_proj'], packed['w_o1'], packed['w_q2'], packed['w_o2'],
      packed['w_ff1'], packed['w_ff2'], packed['vecs'])


# ---------------- pure-JAX reference (mirrors the PyTorch code) ---------------
def ref_self_attention(v, k, q, mask, Wv, Wk, Wq, Wo, bo):
    v4 = v.reshape(N, -1, H, D) @ Wv.T
    k4 = k.reshape(N, -1, H, D) @ Wk.T
    q4 = q.reshape(N, -1, H, D) @ Wq.T
    energy = jnp.einsum('nqhd,nkhd->nhqk', q4, k4)
    energy = jnp.where(mask[:, None, :, :] == 0, NEG, energy)
    att = jax.nn.softmax(energy / math.sqrt(E), axis=3)
    out = jnp.einsum('nhql,nlhd->nqhd', att, v4).reshape(N, -1, E)
    return out @ Wo.T + bo


def ref_layer_norm(x, g, b):
    mu = jnp.mean(x, axis=-1, keepdims=True)
    var = jnp.mean((x - mu) ** 2, axis=-1, keepdims=True)
    return (x - mu) / jnp.sqrt(var + EPS) * g + b


def ref_decoder_block(x, value, key, trg_mask, src_mask, P):
    att1 = ref_self_attention(x, x, x, trg_mask,
                              P['Wv1'], P['Wk1'], P['Wq1'], P['Wo1'], P['bo1'])
    query = ref_layer_norm(att1 + x, P['g0'], P['b0'])
    att2 = ref_self_attention(value, key, query, src_mask,
                              P['Wv2'], P['Wk2'], P['Wq2'], P['Wo2'], P['bo2'])
    x2 = ref_layer_norm(att2 + query, P['g1'], P['b1'])
    h1 = jnp.maximum(x2 @ P['Wff1'].T + P['bff1'], 0.0)
    ff = h1 @ P['Wff2'].T + P['bff2']
    return ref_layer_norm(ff + x2, P['g2'], P['b2'])


# ---------------- parameter construction --------------------------------------
def make_params(rng):
    keys = jax.random.split(rng, 24)
    ki = iter(keys)

    def w(shape, scale=0.1):
        return (scale * jax.random.normal(next(ki), shape)).astype(jnp.float32)

    return {
        # decoder self-attention (PyTorch Linear weights are (out, in))
        'Wq1': w((D, D)), 'Wk1': w((D, D)), 'Wv1': w((D, D)),
        'Wo1': w((E, E)), 'bo1': w((E,)),
        'g0': (1.0 + w((E,))), 'b0': w((E,)),
        # transformer-block attention
        'Wq2': w((D, D)), 'Wk2': w((D, D)), 'Wv2': w((D, D)),
        'Wo2': w((E, E)), 'bo2': w((E,)),
        'g1': (1.0 + w((E,))), 'b1': w((E,)),
        # feed forward
        'Wff1': w((HID, E)), 'bff1': w((HID,)),
        'Wff2': w((E, HID)), 'bff2': w((E,)),
        'g2': (1.0 + w((E,))), 'b2': w((E,)),
    }


if __name__ == "__main__":
    root = jax.random.PRNGKey(0)
    k_p, k_x, k_v, k_k = jax.random.split(root, 4)

    P = make_params(k_p)
    packed = pack_decoder_block_params(P)     # one-time packing, off the hot path

    x = jax.random.normal(k_x, (N, L, E), jnp.float32)
    value = jax.random.normal(k_v, (N, L, E), jnp.float32)
    key = jax.random.normal(k_k, (N, L, E), jnp.float32)

    # causal target mask, all-ones source mask (raw int32, converted in-kernel)
    trg_mask = jnp.tril(jnp.ones((L, L), jnp.int32))[None].repeat(N, axis=0)
    src_mask = jnp.ones((N, L, L), jnp.int32)

    out = decoder_block(x, value, key, trg_mask, src_mask, packed)
    out = jax.block_until_ready(out)

    ref = ref_decoder_block(x, value, key, trg_mask, src_mask, P)
    assert out.shape == (N, L, E)
    err = float(jnp.max(jnp.abs(out - ref)))
    # slight cushion over 1e-4 for rsqrt / post-scale mask bias vs. where+divide.
    assert jnp.allclose(out, ref, atol=2e-4, rtol=2e-4), err

    print("KERNEL_OK")
</pallas_src>

<mosaic_0001>
module attributes {stable_mosaic.version = 11 : i64} {
  func.func @decoder_block_kernel(%arg0: memref<2x8x32xf32, #tpu.memory_space<vmem>>, %arg1: memref<2x8x32xf32, #tpu.memory_space<vmem>>, %arg2: memref<2x8x32xf32, #tpu.memory_space<vmem>>, %arg3: memref<2x8x8xi32, #tpu.memory_space<vmem>>, %arg4: memref<2x8x8xi32, #tpu.memory_space<vmem>>, %arg5: memref<32x160xf32, #tpu.memory_space<vmem>>, %arg6: memref<32x32xf32, #tpu.memory_space<vmem>>, %arg7: memref<32x32xf32, #tpu.memory_space<vmem>>, %arg8: memref<32x32xf32, #tpu.memory_space<vmem>>, %arg9: memref<32x64xf32, #tpu.memory_space<vmem>>, %arg10: memref<64x32xf32, #tpu.memory_space<vmem>>, %arg11: memref<10x64xf32, #tpu.memory_space<vmem>>, %arg12: memref<2x8x32xf32, #tpu.memory_space<vmem>>) attributes {dimension_semantics = [], scalar_prefetch = 0 : i64, scratch_operands = 0 : i64, tpu.core_type = #tpu.core_type<tc>} {
    %c0 = arith.constant 0 : index
    %c0_0 = arith.constant 0 : index
    %c0_1 = arith.constant 0 : index
    %0 = vector.load %arg0[%c0, %c0_0, %c0_1] : memref<2x8x32xf32, #tpu.memory_space<vmem>>, vector<2x8x32xf32>
    %1 = vector.shape_cast %0 : vector<2x8x32xf32> to vector<16x32xf32>
    %c0_2 = arith.constant 0 : index
    %c0_3 = arith.constant 0 : index
    %c0_4 = arith.constant 0 : index
    %2 = vector.load %arg1[%c0_2, %c0_3, %c0_4] : memref<2x8x32xf32, #tpu.memory_space<vmem>>, vector<2x8x32xf32>
    %3 = vector.shape_cast %2 : vector<2x8x32xf32> to vector<16x32xf32>
    %c0_5 = arith.constant 0 : index
    %c0_6 = arith.constant 0 : index
    %c0_7 = arith.constant 0 : index
    %4 = vector.load %arg2[%c0_5, %c0_6, %c0_7] : memref<2x8x32xf32, #tpu.memory_space<vmem>>, vector<2x8x32xf32>
    %5 = vector.shape_cast %4 : vector<2x8x32xf32> to vector<16x32xf32>
    %c0_8 = arith.constant 0 : index
    %c0_9 = arith.constant 0 : index
    %6 = vector.load %arg11[%c0_8, %c0_9] : memref<10x64xf32, #tpu.memory_space<vmem>>, vector<10x64xf32>
    %7 = vector.extract_strided_slice %6 {offsets = [0, 0], sizes = [1, 32], strides = [1, 1]} : vector<10x64xf32> to vector<1x32xf32>
    %8 = vector.extract_strided_slice %6 {offsets = [1, 0], sizes = [1, 32], strides = [1, 1]} : vector<10x64xf32> to vector<1x32xf32>
    %9 = vector.extract_strided_slice %6 {offsets = [2, 0], sizes = [1, 32], strides = [1, 1]} : vector<10x64xf32> to vector<1x32xf32>
    %10 = vector.extract_strided_slice %6 {offsets = [3, 0], sizes = [1, 32], strides = [1, 1]} : vector<10x64xf32> to vector<1x32xf32>
    %11 = vector.extract_strided_slice %6 {offsets = [4, 0], sizes = [1, 32], strides = [1, 1]} : vector<10x64xf32> to vector<1x32xf32>
    %12 = vector.extract_strided_slice %6 {offsets = [5, 0], sizes = [1, 32], strides = [1, 1]} : vector<10x64xf32> to vector<1x32xf32>
    %13 = vector.extract_strided_slice %6 {offsets = [6, 0], sizes = [1, 64], strides = [1, 1]} : vector<10x64xf32> to vector<1x64xf32>
    %14 = vector.extract_strided_slice %6 {offsets = [7, 0], sizes = [1, 32], strides = [1, 1]} : vector<10x64xf32> to vector<1x32xf32>
    %15 = vector.extract_strided_slice %6 {offsets = [8, 0], sizes = [1, 32], strides = [1, 1]} : vector<10x64xf32> to vector<1x32xf32>
    %16 = vector.extract_strided_slice %6 {offsets = [9, 0], sizes = [1, 32], strides = [1, 1]} : vector<10x64xf32> to vector<1x32xf32>
    %c0_10 = arith.constant 0 : index
    %c0_11 = arith.constant 0 : index
    %c0_12 = arith.constant 0 : index
    %17 = vector.load %arg3[%c0_10, %c0_11, %c0_12] : memref<2x8x8xi32, #tpu.memory_space<vmem>>, vector<2x8x8xi32>
    %18 = arith.sitofp %17 : vector<2x8x8xi32> to vector<2x8x8xf32>
    %cst = arith.constant 1.000000e+00 : f32
    %19 = vector.broadcast %cst : f32 to vector<2x8x8xf32>
    %20 = arith.subf %18, %19 : vector<2x8x8xf32>
    %cst_13 = arith.constant 1.000000e+20 : f32
    %21 = vector.broadcast %cst_13 : f32 to vector<2x8x8xf32>
    %22 = arith.mulf %20, %21 : vector<2x8x8xf32>
    %23 = vector.shape_cast %22 : vector<2x8x8xf32> to vector<2x1x8x8xf32>
    %24 = vector.shape_cast %23 : vector<2x1x8x8xf32> to vector<2x1x8x8xf32>
    %25 = vector.broadcast %24 : vector<2x1x8x8xf32> to vector<2x4x8x8xf32>
    %26 = vector.shape_cast %25 : vector<2x4x8x8xf32> to vector<8x8x8xf32>
    %c0_14 = arith.constant 0 : index
    %c0_15 = arith.constant 0 : index
    %c0_16 = arith.constant 0 : index
    %27 = vector.load %arg4[%c0_14, %c0_15, %c0_16] : memref<2x8x8xi32, #tpu.memory_space<vmem>>, vector<2x8x8xi32>
    %28 = arith.sitofp %27 : vector<2x8x8xi32> to vector<2x8x8xf32>
    %cst_17 = arith.constant 1.000000e+00 : f32
    %29 = vector.broadcast %cst_17 : f32 to vector<2x8x8xf32>
    %30 = arith.subf %28, %29 : vector<2x8x8xf32>
    %cst_18 = arith.constant 1.000000e+20 : f32
    %31 = vector.broadcast %cst_18 : f32 to vector<2x8x8xf32>
    %32 = arith.mulf %30, %31 : vector<2x8x8xf32>
    %33 = vector.shape_cast %32 : vector<2x8x8xf32> to vector<2x1x8x8xf32>
    %34 = vector.shape_cast %33 : vector<2x1x8x8xf32> to vector<2x1x8x8xf32>
    %35 = vector.broadcast %34 : vector<2x1x8x8xf32> to vector<2x4x8x8xf32>
    %36 = vector.shape_cast %35 : vector<2x4x8x8xf32> to vector<8x8x8xf32>
    %37 = tpu.concatenate %1, %3, %5 in 0 : vector<16x32xf32>, vector<16x32xf32>, vector<16x32xf32> -> vector<48x32xf32>
    %c0_19 = arith.constant 0 : index
    %c0_20 = arith.constant 0 : index
    %38 = vector.load %arg5[%c0_19, %c0_20] : memref<32x160xf32, #tpu.memory_space<vmem>>, vector<32x160xf32>
    %cst_21 = arith.constant dense<0.000000e+00> : vector<48x160xf32>
    %39 = tpu.matmul %37, %38, %cst_21 {dimension_numbers = #tpu.dot_dimension_numbers<[1], [0], [0], [1], [0, 0, 1, 1], [], []>} : vector<48x32xf32>, vector<32x160xf32>, vector<48x160xf32> -> vector<48x160xf32>
    %40 = vector.extract_strided_slice %39 {offsets = [0, 0], sizes = [16, 96], strides = [1, 1]} : vector<48x160xf32> to vector<16x96xf32>
    %41 = vector.extract_strided_slice %39 {offsets = [16, 96], sizes = [16, 32], strides = [1, 1]} : vector<48x160xf32> to vector<16x32xf32>
    %42 = vector.extract_strided_slice %39 {offsets = [32, 128], sizes = [16, 32], strides = [1, 1]} : vector<48x160xf32> to vector<16x32xf32>
    %43 = vector.extract_strided_slice %40 {offsets = [0, 0], sizes = [16, 32], strides = [1, 1]} : vector<16x96xf32> to vector<16x32xf32>
    %44 = vector.extract_strided_slice %40 {offsets = [0, 32], sizes = [16, 32], strides = [1, 1]} : vector<16x96xf32> to vector<16x32xf32>
    %45 = vector.extract_strided_slice %40 {offsets = [0, 64], sizes = [16, 32], strides = [1, 1]} : vector<16x96xf32> to vector<16x32xf32>
    %c0_22 = arith.constant 0 : index
    %c0_23 = arith.constant 0 : index
    %46 = vector.load %arg6[%c0_22, %c0_23] : memref<32x32xf32, #tpu.memory_space<vmem>>, vector<32x32xf32>
    %47 = vector.extract_strided_slice %43 {offsets = [0, 0], sizes = [16, 8], strides = [1, 1]} : vector<16x32xf32> to vector<16x8xf32>
    %48 = vector.shape_cast %47 : vector<16x8xf32> to vector<2x8x8xf32>
    %49 = vector.extract_strided_slice %43 {offsets = [0, 8], sizes = [16, 8], strides = [1, 1]} : vector<16x32xf32> to vector<16x8xf32>
    %50 = vector.shape_cast %49 : vector<16x8xf32> to vector<2x8x8xf32>
    %51 = vector.extract_strided_slice %43 {offsets = [0, 16], sizes = [16, 8], strides = [1, 1]} : vector<16x32xf32> to vector<16x8xf32>
    %52 = vector.shape_cast %51 : vector<16x8xf32> to vector<2x8x8xf32>
    %53 = vector.extract_strided_slice %43 {offsets = [0, 24], sizes = [16, 8], strides = [1, 1]} : vector<16x32xf32> to vector<16x8xf32>
    %54 = vector.shape_cast %53 : vector<16x8xf32> to vector<2x8x8xf32>
    %55 = vector.shape_cast %48 : vector<2x8x8xf32> to vector<2x1x8x8xf32>
    %56 = vector.shape_cast %50 : vector<2x8x8xf32> to vector<2x1x8x8xf32>
    %57 = vector.shape_cast %52 : vector<2x8x8xf32> to vector<2x1x8x8xf32>
    %58 = vector.shape_cast %54 : vector<2x8x8xf32> to vector<2x1x8x8xf32>
    %59 = tpu.concatenate %55, %56, %57, %58 in 1 : vector<2x1x8x8xf32>, vector<2x1x8x8xf32>, vector<2x1x8x8xf32>, vector<2x1x8x8xf32> -> vector<2x4x8x8xf32>
    %60 = vector.shape_cast %59 : vector<2x4x8x8xf32> to vector<8x8x8xf32>
    %61 = vector.extract_strided_slice %44 {offsets = [0, 0], sizes = [16, 8], strides = [1, 1]} : vector<16x32xf32> to vector<16x8xf32>
    %62 = vector.shape_cast %61 : vector<16x8xf32> to vector<2x8x8xf32>
    %63 = vector.extract_strided_slice %44 {offsets = [0, 8], sizes = [16, 8], strides = [1, 1]} : vector<16x32xf32> to vector<16x8xf32>
    %64 = vector.shape_cast %63 : vector<16x8xf32> to vector<2x8x8xf32>
    %65 = vector.extract_strided_slice %44 {offsets = [0, 16], sizes = [16, 8], strides = [1, 1]} : vector<16x32xf32> to vector<16x8xf32>
    %66 = vector.shape_cast %65 : vector<16x8xf32> to vector<2x8x8xf32>
    %67 = vector.extract_strided_slice %44 {offsets = [0, 24], sizes = [16, 8], strides = [1, 1]} : vector<16x32xf32> to vector<16x8xf32>
    %68 = vector.shape_cast %67 : vector<16x8xf32> to vector<2x8x8xf32>
    %69 = vector.shape_cast %62 : vector<2x8x8xf32> to vector<2x1x8x8xf32>
    %70 = vector.shape_cast %64 : vector<2x8x8xf32> to vector<2x1x8x8xf32>
    %71 = vector.shape_cast %66 : vector<2x8x8xf32> to vector<2x1x8x8xf32>
    %72 = vector.shape_cast %68 : vector<2x8x8xf32> to vector<2x1x8x8xf32>
    %73 = tpu.concatenate %69, %70, %71, %72 in 1 : vector<2x1x8x8xf32>, vector<2x1x8x8xf32>, vector<2x1x8x8xf32>, vector<2x1x8x8xf32> -> vector<2x4x8x8xf32>
    %74 = vector.shape_cast %73 : vector<2x4x8x8xf32> to vector<8x8x8xf32>
    %75 = vector.extract_strided_slice %45 {offsets = [0, 0], sizes = [16, 8], strides = [1, 1]} : vector<16x32xf32> to vector<16x8xf32>
    %76 = vector.shape_cast %75 : vector<16x8xf32> to vector<2x8x8xf32>
    %77 = vector.extract_strided_slice %45 {offsets = [0, 8], sizes = [16, 8], strides = [1, 1]} : vector<16x32xf32> to vector<16x8xf32>
    %78 = vector.shape_cast %77 : vector<16x8xf32> to vector<2x8x8xf32>
    %79 = vector.extract_strided_slice %45 {offsets = [0, 16], sizes = [16, 8], strides = [1, 1]} : vector<16x32xf32> to vector<16x8xf32>
    %80 = vector.shape_cast %79 : vector<16x8xf32> to vector<2x8x8xf32>
    %81 = vector.extract_strided_slice %45 {offsets = [0, 24], sizes = [16, 8], strides = [1, 1]} : vector<16x32xf32> to vector<16x8xf32>
    %82 = vector.shape_cast %81 : vector<16x8xf32> to vector<2x8x8xf32>
    %83 = vector.shape_cast %76 : vector<2x8x8xf32> to vector<2x1x8x8xf32>
    %84 = vector.shape_cast %78 : vector<2x8x8xf32> to vector<2x1x8x8xf32>
    %85 = vector.shape_cast %80 : vector<2x8x8xf32> to vector<2x1x8x8xf32>
    %86 = vector.shape_cast %82 : vector<2x8x8xf32> to vector<2x1x8x8xf32>
    %87 = tpu.concatenate %83, %84, %85, %86 in 1 : vector<2x1x8x8xf32>, vector<2x1x8x8xf32>, vector<2x1x8x8xf32>, vector<2x1x8x8xf32> -> vector<2x4x8x8xf32>
    %88 = vector.shape_cast %87 : vector<2x4x8x8xf32> to vector<8x8x8xf32>
    "tpu.trace_start"() <{level = 10 : i32, message = "bqd,bkd->bqk"}> : () -> ()
    %cst_24 = arith.constant dense<0.000000e+00> : vector<8x8x8xf32>
    %89 = tpu.matmul %60, %74, %cst_24 {dimension_numbers = #tpu.dot_dimension_numbers<[2], [2], [1], [1], [0, 0, 0, 1, 1, 1], [0], [0]>} : vector<8x8x8xf32>, vector<8x8x8xf32>, vector<8x8x8xf32> -> vector<8x8x8xf32>
    "tpu.trace_stop"() : () -> ()
    %cst_25 = arith.constant 0.176776692 : f32
    %90 = vector.broadcast %cst_25 : f32 to vector<8x8x8xf32>
    %91 = arith.mulf %89, %90 : vector<8x8x8xf32>
    %92 = arith.addf %91, %26 : vector<8x8x8xf32>
    %cst_26 = arith.constant dense<0xFF800000> : vector<8x8xf32>
    %93 = vector.multi_reduction <maximumf>, %92, %cst_26 [2] : vector<8x8x8xf32> to vector<8x8xf32>
    %94 = vector.shape_cast %93 : vector<8x8xf32> to vector<8x8x1xf32>
    %95 = vector.broadcast %94 : vector<8x8x1xf32> to vector<8x8x8xf32>
    %96 = arith.subf %92, %95 : vector<8x8x8xf32>
    %97 = math.exp %96 : vector<8x8x8xf32>
    %cst_27 = arith.constant dense<0.000000e+00> : vector<8x8xf32>
    %98 = vector.multi_reduction <add>, %97, %cst_27 [2] : vector<8x8x8xf32> to vector<8x8xf32>
    %99 = vector.shape_cast %98 : vector<8x8xf32> to vector<8x8x1xf32>
    %100 = vector.broadcast %99 : vector<8x8x1xf32> to vector<8x8x8xf32>
    %101 = arith.divf %97, %100 : vector<8x8x8xf32>
    "tpu.trace_start"() <{level = 10 : i32, message = "bqk,bkd->bqd"}> : () -> ()
    %cst_28 = arith.constant dense<0.000000e+00> : vector<8x8x8xf32>
    %102 = tpu.matmul %101, %88, %cst_28 {dimension_numbers = #tpu.dot_dimension_numbers<[2], [1], [1], [2], [0, 0, 0, 1, 1, 2], [0], [0]>} : vector<8x8x8xf32>, vector<8x8x8xf32>, vector<8x8x8xf32> -> vector<8x8x8xf32>
    "tpu.trace_stop"() : () -> ()
    %103 = vector.shape_cast %102 : vector<8x8x8xf32> to vector<2x4x8x8xf32>
    %104 = vector.extract_strided_slice %103 {offsets = [0, 0, 0, 0], sizes = [2, 1, 8, 8], strides = [1, 1, 1, 1]} : vector<2x4x8x8xf32> to vector<2x1x8x8xf32>
    %105 = vector.shape_cast %104 : vector<2x1x8x8xf32> to vector<2x8x8xf32>
    %106 = vector.shape_cast %105 : vector<2x8x8xf32> to vector<16x8xf32>
    %107 = vector.extract_strided_slice %103 {offsets = [0, 1, 0, 0], sizes = [2, 1, 8, 8], strides = [1, 1, 1, 1]} : vector<2x4x8x8xf32> to vector<2x1x8x8xf32>
    %108 = vector.shape_cast %107 : vector<2x1x8x8xf32> to vector<2x8x8xf32>
    %109 = vector.shape_cast %108 : vector<2x8x8xf32> to vector<16x8xf32>
    %110 = vector.extract_strided_slice %103 {offsets = [0, 2, 0, 0], sizes = [2, 1, 8, 8], strides = [1, 1, 1, 1]} : vector<2x4x8x8xf32> to vector<2x1x8x8xf32>
    %111 = vector.shape_cast %110 : vector<2x1x8x8xf32> to vector<2x8x8xf32>
    %112 = vector.shape_cast %111 : vector<2x8x8xf32> to vector<16x8xf32>
    %113 = vector.extract_strided_slice %103 {offsets = [0, 3, 0, 0], sizes = [2, 1, 8, 8], strides = [1, 1, 1, 1]} : vector<2x4x8x8xf32> to vector<2x1x8x8xf32>
    %114 = vector.shape_cast %113 : vector<2x1x8x8xf32> to vector<2x8x8xf32>
    %115 = vector.shape_cast %114 : vector<2x8x8xf32> to vector<16x8xf32>
    %116 = tpu.concatenate %106, %109, %112, %115 in 1 : vector<16x8xf32>, vector<16x8xf32>, vector<16x8xf32>, vector<16x8xf32> -> vector<16x32xf32>
    %cst_29 = arith.constant dense<0.000000e+00> : vector<16x32xf32>
    %117 = tpu.matmul %116, %46, %cst_29 {dimension_numbers = #tpu.dot_dimension_numbers<[1], [0], [0], [1], [0, 0, 1, 1], [], []>} : vector<16x32xf32>, vector<32x32xf32>, vector<16x32xf32> -> vector<16x32xf32>
    %118 = vector.broadcast %7 : vector<1x32xf32> to vector<16x32xf32>
    %119 = arith.addf %117, %118 : vector<16x32xf32>
    %120 = arith.addf %119, %1 : vector<16x32xf32>
    %cst_30 = arith.constant dense<0.000000e+00> : vector<16xf32>
    %121 = vector.multi_reduction <add>, %120, %cst_30 [1] : vector<16x32xf32> to vector<16xf32>
    %122 = vector.shape_cast %121 : vector<16xf32> to vector<16x1xf32>
    %cst_31 = arith.constant 3.200000e+01 : f32
    %123 = vector.broadcast %cst_31 : f32 to vector<16x1xf32>
    %124 = arith.divf %122, %123 : vector<16x1xf32>
    %125 = vector.broadcast %124 : vector<16x1xf32> to vector<16x32xf32>
    %126 = arith.subf %120, %125 : vector<16x32xf32>
    %127 = arith.mulf %126, %126 : vector<16x32xf32>
    %cst_32 = arith.constant dense<0.000000e+00> : vector<16xf32>
    %128 = vector.multi_reduction <add>, %127, %cst_32 [1] : vector<16x32xf32> to vector<16xf32>
    %129 = vector.shape_cast %128 : vector<16xf32> to vector<16x1xf32>
    %cst_33 = arith.constant 3.200000e+01 : f32
    %130 = vector.broadcast %cst_33 : f32 to vector<16x1xf32>
    %131 = arith.divf %129, %130 : vector<16x1xf32>
    %132 = vector.broadcast %124 : vector<16x1xf32> to vector<16x32xf32>
    %133 = arith.subf %120, %132 : vector<16x32xf32>
    %cst_34 = arith.constant 9.99999974E-6 : f32
    %134 = vector.broadcast %cst_34 : f32 to vector<16x1xf32>
    %135 = arith.addf %131, %134 : vector<16x1xf32>
    %136 = math.rsqrt %135 : vector<16x1xf32>
    %137 = vector.broadcast %136 : vector<16x1xf32> to vector<16x32xf32>
    %138 = arith.mulf %133, %137 : vector<16x32xf32>
    %139 = vector.broadcast %8 : vector<1x32xf32> to vector<16x32xf32>
    %140 = arith.mulf %138, %139 : vector<16x32xf32>
    %141 = vector.broadcast %9 : vector<1x32xf32> to vector<16x32xf32>
    %142 = arith.addf %140, %141 : vector<16x32xf32>
    %c0_35 = arith.constant 0 : index
    %c0_36 = arith.constant 0 : index
    %143 = vector.load %arg7[%c0_35, %c0_36] : memref<32x32xf32, #tpu.memory_space<vmem>>, vector<32x32xf32>
    %cst_37 = arith.constant dense<0.000000e+00> : vector<16x32xf32>
    %144 = tpu.matmul %142, %143, %cst_37 {dimension_numbers = #tpu.dot_dimension_numbers<[1], [0], [0], [1], [0, 0, 1, 1], [], []>} : vector<16x32xf32>, vector<32x32xf32>, vector<16x32xf32> -> vector<16x32xf32>
    %c0_38 = arith.constant 0 : index
    %c0_39 = arith.constant 0 : index
    %145 = vector.load %arg8[%c0_38, %c0_39] : memref<32x32xf32, #tpu.memory_space<vmem>>, vector<32x32xf32>
    %146 = vector.extract_strided_slice %144 {offsets = [0, 0], sizes = [16, 8], strides = [1, 1]} : vector<16x32xf32> to vector<16x8xf32>
    %147 = vector.shape_cast %146 : vector<16x8xf32> to vector<2x8x8xf32>
    %148 = vector.extract_strided_slice %144 {offsets = [0, 8], sizes = [16, 8], strides = [1, 1]} : vector<16x32xf32> to vector<16x8xf32>
    %149 = vector.shape_cast %148 : vector<16x8xf32> to vector<2x8x8xf32>
    %150 = vector.extract_strided_slice %144 {offsets = [0, 16], sizes = [16, 8], strides = [1, 1]} : vector<16x32xf32> to vector<16x8xf32>
    %151 = vector.shape_cast %150 : vector<16x8xf32> to vector<2x8x8xf32>
    %152 = vector.extract_strided_slice %144 {offsets = [0, 24], sizes = [16, 8], strides = [1, 1]} : vector<16x32xf32> to vector<16x8xf32>
    %153 = vector.shape_cast %152 : vector<16x8xf32> to vector<2x8x8xf32>
    %154 = vector.shape_cast %147 : vector<2x8x8xf32> to vector<2x1x8x8xf32>
    %155 = vector.shape_cast %149 : vector<2x8x8xf32> to vector<2x1x8x8xf32>
    %156 = vector.shape_cast %151 : vector<2x8x8xf32> to vector<2x1x8x8xf32>
    %157 = vector.shape_cast %153 : vector<2x8x8xf32> to vector<2x1x8x8xf32>
    %158 = tpu.concatenate %154, %155, %156, %157 in 1 : vector<2x1x8x8xf32>, vector<2x1x8x8xf32>, vector<2x1x8x8xf32>, vector<2x1x8x8xf32> -> vector<2x4x8x8xf32>
    %159 = vector.shape_cast %158 : vector<2x4x8x8xf32> to vector<8x8x8xf32>
    %160 = vector.extract_strided_slice %42 {offsets = [0, 0], sizes = [16, 8], strides = [1, 1]} : vector<16x32xf32> to vector<16x8xf32>
    %161 = vector.shape_cast %160 : vector<16x8xf32> to vector<2x8x8xf32>
    %162 = vector.extract_strided_slice %42 {offsets = [0, 8], sizes = [16, 8], strides = [1, 1]} : vector<16x32xf32> to vector<16x8xf32>
    %163 = vector.shape_cast %162 : vector<16x8xf32> to vector<2x8x8xf32>
    %164 = vector.extract_strided_slice %42 {offsets = [0, 16], sizes = [16, 8], strides = [1, 1]} : vector<16x32xf32> to vector<16x8xf32>
    %165 = vector.shape_cast %164 : vector<16x8xf32> to vector<2x8x8xf32>
    %166 = vector.extract_strided_slice %42 {offsets = [0, 24], sizes = [16, 8], strides = [1, 1]} : vector<16x32xf32> to vector<16x8xf32>
    %167 = vector.shape_cast %166 : vector<16x8xf32> to vector<2x8x8xf32>
    %168 = vector.shape_cast %161 : vector<2x8x8xf32> to vector<2x1x8x8xf32>
    %169 = vector.shape_cast %163 : vector<2x8x8xf32> to vector<2x1x8x8xf32>
    %170 = vector.shape_cast %165 : vector<2x8x8xf32> to vector<2x1x8x8xf32>
    %171 = vector.shape_cast %167 : vector<2x8x8xf32> to vector<2x1x8x8xf32>
    %172 = tpu.concatenate %168, %169, %170, %171 in 1 : vector<2x1x8x8xf32>, vector<2x1x8x8xf32>, vector<2x1x8x8xf32>, vector<2x1x8x8xf32> -> vector<2x4x8x8xf32>
    %173 = vector.shape_cast %172 : vector<2x4x8x8xf32> to vector<8x8x8xf32>
    %174 = vector.extract_strided_slice %41 {offsets = [0, 0], sizes = [16, 8], strides = [1, 1]} : vector<16x32xf32> to vector<16x8xf32>
    %175 = vector.shape_cast %174 : vector<16x8xf32> to vector<2x8x8xf32>
    %176 = vector.extract_strided_slice %41 {offsets = [0, 8], sizes = [16, 8], strides = [1, 1]} : vector<16x32xf32> to vector<16x8xf32>
    %177 = vector.shape_cast %176 : vector<16x8xf32> to vector<2x8x8xf32>
    %178 = vector.extract_strided_slice %41 {offsets = [0, 16], sizes = [16, 8], strides = [1, 1]} : vector<16x32xf32> to vector<16x8xf32>
    %179 = vector.shape_cast %178 : vector<16x8xf32> to vector<2x8x8xf32>
    %180 = vector.extract_strided_slice %41 {offsets = [0, 24], sizes = [16, 8], strides = [1, 1]} : vector<16x32xf32> to vector<16x8xf32>
    %181 = vector.shape_cast %180 : vector<16x8xf32> to vector<2x8x8xf32>
    %182 = vector.shape_cast %175 : vector<2x8x8xf32> to vector<2x1x8x8xf32>
    %183 = vector.shape_cast %177 : vector<2x8x8xf32> to vector<2x1x8x8xf32>
    %184 = vector.shape_cast %179 : vector<2x8x8xf32> to vector<2x1x8x8xf32>
    %185 = vector.shape_cast %181 : vector<2x8x8xf32> to vector<2x1x8x8xf32>
    %186 = tpu.concatenate %182, %183, %184, %185 in 1 : vector<2x1x8x8xf32>, vector<2x1x8x8xf32>, vector<2x1x8x8xf32>, vector<2x1x8x8xf32> -> vector<2x4x8x8xf32>
    %187 = vector.shape_cast %186 : vector<2x4x8x8xf32> to vector<8x8x8xf32>
    "tpu.trace_start"() <{level = 10 : i32, message = "bqd,bkd->bqk"}> : () -> ()
    %cst_40 = arith.constant dense<0.000000e+00> : vector<8x8x8xf32>
    %188 = tpu.matmul %159, %173, %cst_40 {dimension_numbers = #tpu.dot_dimension_numbers<[2], [2], [1], [1], [0, 0, 0, 1, 1, 1], [0], [0]>} : vector<8x8x8xf32>, vector<8x8x8xf32>, vector<8x8x8xf32> -> vector<8x8x8xf32>
    "tpu.trace_stop"() : () -> ()
    %cst_41 = arith.constant 0.176776692 : f32
    %189 = vector.broadcast %cst_41 : f32 to vector<8x8x8xf32>
    %190 = arith.mulf %188, %189 : vector<8x8x8xf32>
    %191 = arith.addf %190, %36 : vector<8x8x8xf32>
    %cst_42 = arith.constant dense<0xFF800000> : vector<8x8xf32>
    %192 = vector.multi_reduction <maximumf>, %191, %cst_42 [2] : vector<8x8x8xf32> to vector<8x8xf32>
    %193 = vector.shape_cast %192 : vector<8x8xf32> to vector<8x8x1xf32>
    %194 = vector.broadcast %193 : vector<8x8x1xf32> to vector<8x8x8xf32>
    %195 = arith.subf %191, %194 : vector<8x8x8xf32>
    %196 = math.exp %195 : vector<8x8x8xf32>
    %cst_43 = arith.constant dense<0.000000e+00> : vector<8x8xf32>
    %197 = vector.multi_reduction <add>, %196, %cst_43 [2] : vector<8x8x8xf32> to vector<8x8xf32>
    %198 = vector.shape_cast %197 : vector<8x8xf32> to vector<8x8x1xf32>
    %199 = vector.broadcast %198 : vector<8x8x1xf32> to vector<8x8x8xf32>
    %200 = arith.divf %196, %199 : vector<8x8x8xf32>
    "tpu.trace_start"() <{level = 10 : i32, message = "bqk,bkd->bqd"}> : () -> ()
    %cst_44 = arith.constant dense<0.000000e+00> : vector<8x8x8xf32>
    %201 = tpu.matmul %200, %187, %cst_44 {dimension_numbers = #tpu.dot_dimension_numbers<[2], [1], [1], [2], [0, 0, 0, 1, 1, 2], [0], [0]>} : vector<8x8x8xf32>, vector<8x8x8xf32>, vector<8x8x8xf32> -> vector<8x8x8xf32>
    "tpu.trace_stop"() : () -> ()
    %202 = vector.shape_cast %201 : vector<8x8x8xf32> to vector<2x4x8x8xf32>
    %203 = vector.extract_strided_slice %202 {offsets = [0, 0, 0, 0], sizes = [2, 1, 8, 8], strides = [1, 1, 1, 1]} : vector<2x4x8x8xf32> to vector<2x1x8x8xf32>
    %204 = vector.shape_cast %203 : vector<2x1x8x8xf32> to vector<2x8x8xf32>
    %205 = vector.shape_cast %204 : vector<2x8x8xf32> to vector<16x8xf32>
    %206 = vector.extract_strided_slice %202 {offsets = [0, 1, 0, 0], sizes = [2, 1, 8, 8], strides = [1, 1, 1, 1]} : vector<2x4x8x8xf32> to vector<2x1x8x8xf32>
    %207 = vector.shape_cast %206 : vector<2x1x8x8xf32> to vector<2x8x8xf32>
    %208 = vector.shape_cast %207 : vector<2x8x8xf32> to vector<16x8xf32>
    %209 = vector.extract_strided_slice %202 {offsets = [0, 2, 0, 0], sizes = [2, 1, 8, 8], strides = [1, 1, 1, 1]} : vector<2x4x8x8xf32> to vector<2x1x8x8xf32>
    %210 = vector.shape_cast %209 : vector<2x1x8x8xf32> to vector<2x8x8xf32>
    %211 = vector.shape_cast %210 : vector<2x8x8xf32> to vector<16x8xf32>
    %212 = vector.extract_strided_slice %202 {offsets = [0, 3, 0, 0], sizes = [2, 1, 8, 8], strides = [1, 1, 1, 1]} : vector<2x4x8x8xf32> to vector<2x1x8x8xf32>
    %213 = vector.shape_cast %212 : vector<2x1x8x8xf32> to vector<2x8x8xf32>
    %214 = vector.shape_cast %213 : vector<2x8x8xf32> to vector<16x8xf32>
    %215 = tpu.concatenate %205, %208, %211, %214 in 1 : vector<16x8xf32>, vector<16x8xf32>, vector<16x8xf32>, vector<16x8xf32> -> vector<16x32xf32>
    %cst_45 = arith.constant dense<0.000000e+00> : vector<16x32xf32>
    %216 = tpu.matmul %215, %145, %cst_45 {dimension_numbers = #tpu.dot_dimension_numbers<[1], [0], [0], [1], [0, 0, 1, 1], [], []>} : vector<16x32xf32>, vector<32x32xf32>, vector<16x32xf32> -> vector<16x32xf32>
    %217 = vector.broadcast %10 : vector<1x32xf32> to vector<16x32xf32>
    %218 = arith.addf %216, %217 : vector<16x32xf32>
    %219 = arith.addf %218, %142 : vector<16x32xf32>
    %cst_46 = arith.constant dense<0.000000e+00> : vector<16xf32>
    %220 = vector.multi_reduction <add>, %219, %cst_46 [1] : vector<16x32xf32> to vector<16xf32>
    %221 = vector.shape_cast %220 : vector<16xf32> to vector<16x1xf32>
    %cst_47 = arith.constant 3.200000e+01 : f32
    %222 = vector.broadcast %cst_47 : f32 to vector<16x1xf32>
    %223 = arith.divf %221, %222 : vector<16x1xf32>
    %224 = vector.broadcast %223 : vector<16x1xf32> to vector<16x32xf32>
    %225 = arith.subf %219, %224 : vector<16x32xf32>
    %226 = arith.mulf %225, %225 : vector<16x32xf32>
    %cst_48 = arith.constant dense<0.000000e+00> : vector<16xf32>
    %227 = vector.multi_reduction <add>, %226, %cst_48 [1] : vector<16x32xf32> to vector<16xf32>
    %228 = vector.shape_cast %227 : vector<16xf32> to vector<16x1xf32>
    %cst_49 = arith.constant 3.200000e+01 : f32
    %229 = vector.broadcast %cst_49 : f32 to vector<16x1xf32>
    %230 = arith.divf %228, %229 : vector<16x1xf32>
    %231 = vector.broadcast %223 : vector<16x1xf32> to vector<16x32xf32>
    %232 = arith.subf %219, %231 : vector<16x32xf32>
    %cst_50 = arith.constant 9.99999974E-6 : f32
    %233 = vector.broadcast %cst_50 : f32 to vector<16x1xf32>
    %234 = arith.addf %230, %233 : vector<16x1xf32>
    %235 = math.rsqrt %234 : vector<16x1xf32>
    %236 = vector.broadcast %235 : vector<16x1xf32> to vector<16x32xf32>
    %237 = arith.mulf %232, %236 : vector<16x32xf32>
    %238 = vector.broadcast %11 : vector<1x32xf32> to vector<16x32xf32>
    %239 = arith.mulf %237, %238 : vector<16x32xf32>
    %240 = vector.broadcast %12 : vector<1x32xf32> to vector<16x32xf32>
    %241 = arith.addf %239, %240 : vector<16x32xf32>
    %c0_51 = arith.constant 0 : index
    %c0_52 = arith.constant 0 : index
    %242 = vector.load %arg9[%c0_51, %c0_52] : memref<32x64xf32, #tpu.memory_space<vmem>>, vector<32x64xf32>
    %cst_53 = arith.constant dense<0.000000e+00> : vector<16x64xf32>
    %243 = tpu.matmul %241, %242, %cst_53 {dimension_numbers = #tpu.dot_dimension_numbers<[1], [0], [0], [1], [0, 0, 1, 1], [], []>} : vector<16x32xf32>, vector<32x64xf32>, vector<16x64xf32> -> vector<16x64xf32>
    %244 = vector.broadcast %13 : vector<1x64xf32> to vector<16x64xf32>
    %245 = arith.addf %243, %244 : vector<16x64xf32>
    %cst_54 = arith.constant 0.000000e+00 : f32
    %246 = vector.broadcast %cst_54 : f32 to vector<16x64xf32>
    %247 = arith.maximumf %245, %246 : vector<16x64xf32>
    %c0_55 = arith.constant 0 : index
    %c0_56 = arith.constant 0 : index
    %248 = vector.load %arg10[%c0_55, %c0_56] : memref<64x32xf32, #tpu.memory_space<vmem>>, vector<64x32xf32>
    %cst_57 = arith.constant dense<0.000000e+00> : vector<16x32xf32>
    %249 = tpu.matmul %247, %248, %cst_57 {dimension_numbers = #tpu.dot_dimension_numbers<[1], [0], [0], [1], [0, 0, 1, 1], [], []>} : vector<16x64xf32>, vector<64x32xf32>, vector<16x32xf32> -> vector<16x32xf32>
    %250 = vector.broadcast %14 : vector<1x32xf32> to vector<16x32xf32>
    %251 = arith.addf %249, %250 : vector<16x32xf32>
    %252 = arith.addf %251, %241 : vector<16x32xf32>
    %cst_58 = arith.constant dense<0.000000e+00> : vector<16xf32>
    %253 = vector.multi_reduction <add>, %252, %cst_58 [1] : vector<16x32xf32> to vector<16xf32>
    %254 = vector.shape_cast %253 : vector<16xf32> to vector<16x1xf32>
    %cst_59 = arith.constant 3.200000e+01 : f32
    %255 = vector.broadcast %cst_59 : f32 to vector<16x1xf32>
    %256 = arith.divf %254, %255 : vector<16x1xf32>
    %257 = vector.broadcast %256 : vector<16x1xf32> to vector<16x32xf32>
    %258 = arith.subf %252, %257 : vector<16x32xf32>
    %259 = arith.mulf %258, %258 : vector<16x32xf32>
    %cst_60 = arith.constant dense<0.000000e+00> : vector<16xf32>
    %260 = vector.multi_reduction <add>, %259, %cst_60 [1] : vector<16x32xf32> to vector<16xf32>
    %261 = vector.shape_cast %260 : vector<16xf32> to vector<16x1xf32>
    %cst_61 = arith.constant 3.200000e+01 : f32
    %262 = vector.broadcast %cst_61 : f32 to vector<16x1xf32>
    %263 = arith.divf %261, %262 : vector<16x1xf32>
    %264 = vector.broadcast %256 : vector<16x1xf32> to vector<16x32xf32>
    %265 = arith.subf %252, %264 : vector<16x32xf32>
    %cst_62 = arith.constant 9.99999974E-6 : f32
    %266 = vector.broadcast %cst_62 : f32 to vector<16x1xf32>
    %267 = arith.addf %263, %266 : vector<16x1xf32>
    %268 = math.rsqrt %267 : vector<16x1xf32>
    %269 = vector.broadcast %268 : vector<16x1xf32> to vector<16x32xf32>
    %270 = arith.mulf %265, %269 : vector<16x32xf32>
    %271 = vector.broadcast %15 : vector<1x32xf32> to vector<16x32xf32>
    %272 = arith.mulf %270, %271 : vector<16x32xf32>
    %273 = vector.broadcast %16 : vector<1x32xf32> to vector<16x32xf32>
    %274 = arith.addf %272, %273 : vector<16x32xf32>
    %275 = vector.shape_cast %274 : vector<16x32xf32> to vector<2x8x32xf32>
    %c0_63 = arith.constant 0 : index
    %c0_64 = arith.constant 0 : index
    %c0_65 = arith.constant 0 : index
    %276 = vector.load %arg12[%c0_63, %c0_64, %c0_65] : memref<2x8x32xf32, #tpu.memory_space<vmem>>, vector<2x8x32xf32>
    tpu.vector_store %arg12[%c0_63, %c0_64, %c0_65], %275 {strides = array<i32>} : memref<2x8x32xf32, #tpu.memory_space<vmem>>, vector<2x8x32xf32>,
    return
  }
}

</mosaic_0001>

<bundles_post_ra>
// kernel: decoder_block.1
= control target key start
LH: loop header
LB: loop body
LE: loop exit
PB: predicated region body
PF: predicated region fallthrough
CT: control target
= control target key end

     0   :  { %17 = vsyncpa [#allocation3], 0  ;;  %s3139_s0 = inlined_call_operand.hbm [shape: f32[2,8,32], index: 0, kind: input, shape index: {}]   ;;  %s3140_s1 = inlined_call_operand.hbm [shape: f32[2,8,32], index: 1, kind: input, shape index: {}]   ;;  %s3141_s2 = inlined_call_operand.hbm [shape: f32[2,8,32], index: 2, kind: input, shape index: {}]   ;;  %s3142_s3 = inlined_call_operand.hbm [shape: s32[2,8,8], index: 3, kind: input, shape index: {}]   ;;  %s3143_s4 = inlined_call_operand.hbm [shape: s32[2,8,8], index: 4, kind: input, shape index: {}]   ;;  %s3144_s5 = inlined_call_operand.vmem [shape: f32[32,160], index: 5, kind: input, shape index: {}]   ;;  %s3145_s6 = inlined_call_operand.vmem [shape: f32[32,32], index: 6, kind: input, shape index: {}]   ;;  %s3146_s7 = inlined_call_operand.hbm [shape: f32[32,32], index: 7, kind: input, shape index: {}]   ;;  %s3147_s8 = inlined_call_operand.hbm [shape: f32[32,32], index: 8, kind: input, shape index: {}]   ;;  %s3148_s9 = inlined_call_operand.hbm [shape: f32[32,64], index: 9, kind: input, shape index: {}]   ;;  %s3149_s10 = inlined_call_operand.vmem [shape: f32[64,32], index: 10, kind: input, shape index: {}]   ;;  %s3150_s11 = inlined_call_operand.hbm [shape: f32[10,64], index: 11, kind: input, shape index: {}]   ;;  %s3151_s12 = inlined_call_operand.hbm [shape: f32[2,8,32], index: 12, kind: output, shape index: {}]  }
   0x1   :  { %18 = vsyncpa [#allocation6], 0 }
   0x2   :  { %19 = vsyncpa [#allocation9], 0 }
   0x3   :  { %20 = vsyncpa [#allocation12], 0 }
   0x4   :  { %21 = vsyncpa [#allocation15], 0 }
   0x5   :  { %22 = vsyncpa [#allocation4], 0  ;;  %s40_s23 = sshll.u32 %s3140_s1, 4  ;;  %s2487_s24 = smov [#allocation5]   ;;  %s41_s23 = int_to_ptr.hbm [resolvable:$true] %s40_s23 }
   0x6   :  { %s42_s25 = sshll.u32 %s2487_s24, 4  ;;  %s66_s28 = sshll.u32 %s3142_s3, 4  ;;  %s43_s25 = int_to_ptr.vmem [resolvable:$true] %s42_s25  ;;  %s67_s28 = int_to_ptr.hbm [resolvable:$true] %s66_s28 }
   0x7   :  { %s2488_s29 = smov 128   ;;  %s2489_s30 = smov 8  }
   0x8   :  { %48 = dma.hbm_to_vmem [thread:$0]  %s41_s23, 256, %s43_s25, [#allocation6], %s2488_s29, %s2488_s29, %s2489_s30  }
   0x9   :  { %s2490_s13 = smov [#allocation8]   ;;  %s96_s1 = sshll.u32 %s3146_s7, 4  ;;  %s97_s1 = int_to_ptr.hbm [resolvable:$true] %s96_s1 }
   0xa   :  { %s68_s14 = sshll.u32 %s2490_s13, 4  ;;  %s122_s18 = sshll.u32 %s3148_s9, 4  ;;  %s69_s14 = int_to_ptr.vmem [resolvable:$true] %s68_s14  ;;  %s123_s18 = int_to_ptr.hbm [resolvable:$true] %s122_s18 }
   0xb   :  { %74 = dma.hbm_to_vmem [thread:$0]  %s67_s28, 256, %s69_s14, [#allocation9], %s2488_s29, %s2488_s29, %s2489_s30  }
   0xc   :  { %s2491_s19 = smov [#allocation11]   ;;  %s2492_s21 = smov [#allocation14]  }
   0xd   :  { %s98_s20 = sshll.u32 %s2491_s19, 4  ;;  %s124_s7 = sshll.u32 %s2492_s21, 4  ;;  %s99_s20 = int_to_ptr.vmem [resolvable:$true] %s98_s20  ;;  %s125_s7 = int_to_ptr.vmem [resolvable:$true] %s124_s7 }
   0xe   :  { %104 = dma.hbm_to_vmem [thread:$0]  %s97_s1, 512, %s99_s20, [#allocation12], %s2488_s29, %s2488_s29, %s2489_s30  }
   0xf   :  { %s27_s24 = sshll.u32 %s3139_s0, 4  ;;  %s53_s26 = sshll.u32 %s3141_s2, 4  ;;  %s28_s24 = int_to_ptr.hbm [resolvable:$true] %s27_s24  ;;  %s54_s26 = int_to_ptr.hbm [resolvable:$true] %s53_s26 }
  0x10   :  { %130 = dma.hbm_to_vmem [thread:$0]  %s123_s18, 512, %s125_s7, [#allocation15], %s2488_s29, %s2488_s29, %s2489_s30  }
  0x11   :  { %s2493_s27 = smov [#allocation2]   ;;  %s2494_s13 = smov [#allocation7]  }
  0x12   :  { %s29_s28 = sshll.u32 %s2493_s27, 4  ;;  %s55_s0 = sshll.u32 %s2494_s13, 4  ;;  %s30_s28 = int_to_ptr.vmem [resolvable:$true] %s29_s28  ;;  %s56_s0 = int_to_ptr.vmem [resolvable:$true] %s55_s0 }
  0x13   :  { %35 = dma.hbm_to_vmem [thread:$0]  %s28_s24, 256, %s30_s28, [#allocation3], %s2488_s29, %s2488_s29, %s2489_s30  }
  0x14   :  { %s79_s16 = sshll.u32 %s3143_s4, 4  ;;  %s109_s3 = sshll.u32 %s3147_s8, 4  ;;  %s80_s16 = int_to_ptr.hbm [resolvable:$true] %s79_s16  ;;  %s110_s3 = int_to_ptr.hbm [resolvable:$true] %s109_s3 }
  0x15   :  { %61 = dma.hbm_to_vmem [thread:$0]  %s54_s26, 256, %s56_s0, [#allocation6], %s2488_s29, %s2488_s29, %s2489_s30  }
  0x16   :  { %s2495_s17 = smov [#allocation10]   ;;  %s2496_s19 = smov [#allocation13]  }
  0x17   :  { %s81_s18 = sshll.u32 %s2495_s17, 4  ;;  %s111_s4 = sshll.u32 %s2496_s19, 4  ;;  %s82_s18 = int_to_ptr.vmem [resolvable:$true] %s81_s18  ;;  %s112_s4 = int_to_ptr.vmem [resolvable:$true] %s111_s4 }
  0x18   :  { %87 = dma.hbm_to_vmem [thread:$0]  %s80_s16, 256, %s82_s18, [#allocation9], %s2488_s29, %s2488_s29, %s2489_s30  }
  0x19   :  { %s137_s7 = sshll.u32 %s3150_s11, 4  ;;  %s2497_s8 = smov [#allocation16]   ;;  %s138_s7 = int_to_ptr.hbm [resolvable:$true] %s137_s7 }
  0x1a   :  { %117 = dma.hbm_to_vmem [thread:$0]  %s110_s3, 512, %s112_s4, [#allocation12], %s2488_s29, %s2488_s29, %s2489_s30  }
  0x1b   :  { %s139_s22 = sshll.u32 %s2497_s8, 4  ;;  %s140_s22 = int_to_ptr.vmem [resolvable:$true] %s139_s22 }
  0x1c   :  { %145 = dma.hbm_to_vmem [thread:$0]  %s138_s7, 256, %s140_s22, [#allocation15], %s2488_s29, %s2488_s29, %s2489_s30  }
  0x1d   :  { %2475 = dma.done.wait [#allocation3], 256  }
  0x1e   :  { %2476 = vsyncadd [#allocation3], 4294967040 }
  0x1f   :  { %2477 = dma.done.wait [#allocation6], 512  }
  0x20   :  { %2478 = vsyncadd [#allocation6], 4294966784 }
  0x21   :  { %2479 = dma.done.wait [#allocation9], 512  }
  0x22   :  { %2480 = vsyncadd [#allocation9], 4294966784 }
  0x23   :  { %2481 = dma.done.wait [#allocation12], 1024  }
  0x24   :  { %2482 = vsyncadd [#allocation12], 4294966272 }
  0x25   :  { %2483 = dma.done.wait [#allocation15], 768  }
  0x26   :  { %2484 = vsyncadd [#allocation15], 4294966528  ;;  %v212_v0 = vld [vmem:[%s3144_s5 + $0x30] sm:$0xff]  ;;  %v210_v1 = vld [vmem:[%s3144_s5 + $0x20] sm:$0xff]  ;;  %vm214_vm0 = vcmask 261120   ;;  %s2498_s13 = smov 104  }
  0x27   :  { %245 = vmatpush.msra.mxu0 %v212_v0  ;;  %2086 = vmatpush.msra.mxu1 %v212_v0  ;;  %v208_v2 = vld [vmem:[%s3144_s5 + $0x10] sm:$0xff]  ;;  %v206_v3 = vld [vmem:[%s3144_s5] sm:$0xff]  ;;  %v2643_v5 = vld [vmem:[#allocation2 + $0x8] sm:$0xff]  ;;  %s2499_s0 = smov 120   ;;  %s2500_s14 = smov 112   ;;  %vm317_vm1 = vcmask 64512  }
  0x28   :  { %v2639_v4 = vld [vmem:[#allocation2] sm:$0xff]  ;;  %s2501_s15 = smov 96   ;;  %v190_v22 = vld [vmem:[#allocation8] sm:$0xff]  ;;  %v191_v36 = vld [vmem:[#allocation8 + $0x8] sm:$0xff]  ;;  %s2502_s16 = smov 64  }
  0x29   :  { %246 = vmatpush.msra.mxu0 %v210_v1  ;;  %2087 = vmatpush.msra.mxu1 %v210_v1  ;;  %v192_v23 = vcvt.s32.f32 %v190_v22  ;;  %v193_v40 = vcvt.s32.f32 %v191_v36  ;;  %s2503_s9 = smov 16   ;;  %s2504_s25 = smov 24  }
  0x2a   :  { %s1995_s8 = sshll.u32 %s3151_s12, 4  ;;  %s1996_s8 = int_to_ptr.hbm [resolvable:$true] %s1995_s8 }
  0x2b   :  { %247 = vmatpush.msra.mxu0 %v208_v2  ;;  %2088 = vmatpush.msra.mxu1 %v208_v2  ;;  %v2012_v24 = vadd.f32 -1.0, %v192_v23  ;;  %v2013_v44 = vadd.f32 -1.0, %v193_v40 }
  0x2d   :  { %248 = vmatpush.msra.mxu0 %v206_v3  ;;  %2089 = vmatpush.msra.mxu1 %v206_v3  ;;  %v196_v25 = vmul.f32 1e+20, %v2012_v24  ;;  %v197_v47 = vmul.f32 1e+20, %v2013_v44 }
  0x2e   :  { %2016 = vmatmul.msk.f32.vlgmr.msra.gmra.mxu0 %vm214_vm0, %v2639_v4 }
  0x36   :  { %2017 = vmatmul.msk.f32.gmra.mxu0 %vm214_vm0, %v2643_v5 }
  0xab   :  { %v2647_v6 = vpop.f32.mrf.mxu0 }
  0xac   :  { %311 = vrot.lane.b32.xlu1 %v2647_v6, %s2498_s13  ;;  %303 = vrot.lane.b32.xlu0 %v2647_v6, %s2499_s0 }
  0xb3   :  { %v2653_v7 = vpop.f32.mrf.mxu0 }
  0xb4   :  { %307 = vrot.lane.b32.xlu0 %v2647_v6, %s2500_s14  ;;  %309 = vrot.lane.b32.xlu2 %v2653_v7, %s2500_s14 }
  0xb5   :  { %305 = vrot.lane.b32.xlu1 %v2653_v7, %s2499_s0 }
  0xbc   :  { %315 = vrot.lane.b32.xlu0 %v2647_v6, %s2501_s15  ;;  %313 = vrot.lane.b32.xlu2 %v2653_v7, %s2498_s13 }
 0x10e   :  { %v2670_v10 = vpop.permute.xlu2 %309 }
 0x116   :  { %v2677_v12 = vpop.permute.xlu2 %313 }
 0x11e   :  { %v2664_v8 = vpop.permute.xlu1 %311  ;;  %v2666_v9 = vpop.permute.xlu0 %303 }
 0x11f   :  { %394 = vrot.lane.b32.xlu0 %v2664_v8, %s2501_s15  ;;  %342 = vrot.lane.b32.xlu1 %v2666_v9, %s2501_s15  ;;  %v2111_v3 = vpack.i.bf16 %v2647_v6, %v2666_v9 }
 0x126   :  { %v2672_v11 = vpop.permute.xlu0 %307 }
 0x127   :  { %368 = vrot.lane.b32.xlu2 %v2672_v11, %s2501_s15  ;;  %420 = vrot.lane.b32.xlu1 %v2653_v7, %s2501_s15  ;;  %v2679_v13 = vpop.permute.xlu1 %305 }
 0x128   :  { %472 = vrot.lane.b32.xlu0 %v2670_v10, %s2501_s15 }
 0x12e   :  { %v316_v14 = vpop.permute.xlu0 %315 }
 0x12f   :  { %2028 = vmatpush.xpose.msk.msra.mxu2 %vm317_vm1, %v316_v14  ;;  %498 = vrot.lane.b32.xlu1 %v2677_v12, %s2501_s15 }
 0x130   :  { %446 = vrot.lane.b32.xlu2 %v2679_v13, %s2501_s15 }
 0x132   :  { %2029 = vmatmul.msk.f32.vlgmr.msra.gmra.mxu2 %vm317_vm1, %v2647_v6 }
 0x181   :  { %v369_v15 = vpop.permute.xlu2 %368 }
 0x182   :  { %2032 = vmatpush.xpose.msk.msrb.mxu2 %vm317_vm1, %v369_v15 }
 0x185   :  { %2033 = vmatmul.msk.f32.vlgmr.msrb.gmra.mxu2 %vm317_vm1, %v2672_v11 }
 0x18a   :  { %v447_v18 = vpop.permute.xlu2 %446 }
 0x191   :  { %v395_v16 = vpop.permute.xlu0 %394  ;;  %v343_v17 = vpop.permute.xlu1 %342 }
 0x192   :  { %2030 = vmatpush.xpose.msk.msra.mxu3 %vm317_vm1, %v343_v17 }
 0x195   :  { %2031 = vmatmul.msk.f32.vlgmr.msra.gmra.mxu3 %vm317_vm1, %v2666_v9 }
 0x196   :  { %2034 = vmatpush.xpose.msk.msrb.mxu3 %vm317_vm1, %v395_v16 }
 0x199   :  { %v421_v19 = vpop.permute.xlu1 %420 }
 0x19a   :  { %2038 = vmatpush.xpose.msk.msra.mxu3 %vm317_vm1, %v447_v18  ;;  %2036 = vmatpush.xpose.msk.msra.mxu2 %vm317_vm1, %v421_v19  ;;  %v473_v20 = vpop.permute.xlu0 %472 }
 0x19d   :  { %2035 = vmatmul.msk.f32.vlgmr.msrb.gmra.mxu3 %vm317_vm1, %v2664_v8  ;;  %2037 = vmatmul.msk.f32.vlgmr.msra.gmra.mxu2 %vm317_vm1, %v2653_v7 }
 0x19e   :  { %2040 = vmatpush.xpose.msk.msrb.mxu2 %vm317_vm1, %v473_v20 }
 0x1a1   :  { %v499_v21 = vpop.permute.xlu1 %498 }
 0x1a2   :  { %2042 = vmatpush.xpose.msk.msrb.mxu3 %vm317_vm1, %v499_v21 }
 0x1a5   :  { %2039 = vmatmul.msk.f32.vlgmr.msra.gmra.mxu3 %vm317_vm1, %v2679_v13  ;;  %2041 = vmatmul.msk.f32.vlgmr.msrb.gmra.mxu2 %vm317_vm1, %v2670_v10 }
 0x1ad   :  { %2043 = vmatmul.msk.f32.vlgmr.msrb.gmra.mxu3 %vm317_vm1, %v2677_v12 }
 0x1b5   :  { %v339_v26 = vpop.f32.mrf.mxu2 }
 0x1b6   :  { %v524_v27 = vmul.f32 0.17677669, %v339_v26 }
 0x1b8   :  { %v532_v28 = vadd.f32 %v524_v27, %v196_v25 }
 0x1ba   :  { %v540_v29 = vsel %vm317_vm1, %v532_v28, -inf }
 0x1bb   :  { %541 = vmax.xlane.f32.xlu0 %v540_v29 }
 0x208   :  { %v391_v32 = vpop.f32.mrf.mxu2 }
 0x209   :  { %v526_v34 = vmul.f32 0.17677669, %v391_v32 }
 0x20b   :  { %v534_v39 = vadd.f32 %v526_v34, %v196_v25 }
 0x20d   :  { %v546_v42 = vsel %vm317_vm1, %v534_v39, -inf }
 0x218   :  { %v365_v30 = vpop.f32.mrf.mxu3 }
 0x219   :  { %v525_v31 = vmul.f32 0.17677669, %v365_v30 }
 0x21b   :  { %v533_v33 = vadd.f32 %v525_v31, %v196_v25 }
 0x21d   :  { %v543_v35 = vsel %vm317_vm1, %v533_v33, -inf }
 0x21e   :  { %544 = vmax.xlane.f32.xlu2 %v543_v35 }
 0x220   :  { %v417_v37 = vpop.f32.mrf.mxu3  ;;  %v443_v49 = vpop.f32.mrf.mxu2 }
 0x221   :  { %v527_v38 = vmul.f32 0.17677669, %v417_v37  ;;  %v528_v57 = vmul.f32 0.17677669, %v443_v49 }
 0x223   :  { %v535_v41 = vadd.f32 %v527_v38, %v196_v25  ;;  %v2715_v61 = vadd.f32 %v528_v57, %v197_v47 }
 0x225   :  { %v549_v43 = vsel %vm317_vm1, %v535_v41, -inf  ;;  %v552_v0 = vsel %vm317_vm1, %v2715_v61, -inf }
 0x226   :  { %547 = vmax.xlane.f32.xlu2 %v546_v42  ;;  %550 = vmax.xlane.f32.xlu1 %v549_v43 }
 0x228   :  { %v469_v45 = vpop.f32.mrf.mxu3  ;;  %v495_v59 = vpop.f32.mrf.mxu2 }
 0x229   :  { %v529_v46 = vmul.f32 0.17677669, %v469_v45  ;;  %v530_v62 = vmul.f32 0.17677669, %v495_v59  ;;  %v211_v59 = vld [vmem:[%s3144_s5 + $0x28] sm:$0xff] }
 0x22b   :  { %v537_v48 = vadd.f32 %v529_v46, %v197_v47  ;;  %v538_v1 = vadd.f32 %v530_v62, %v197_v47 }
 0x22d   :  { %v555_v50 = vsel %vm317_vm1, %v537_v48, -inf  ;;  %v558_v2 = vsel %vm317_vm1, %v538_v1, -inf }
 0x22e   :  { %v542_v51 = vpop.xlane.xlu0 %541  ;;  %556 = vmax.xlane.f32.xlu2 %v555_v50 }
 0x22f   :  { %v564_v52 = vsub.f32 %v532_v28, %v542_v51  ;;  %v2121_v51 = vpack.i.bf16 %v2677_v12, %v2670_v10  ;;  %v2116_v10 = vpack.i.bf16 %v2672_v11, %v2664_v8  ;;  %v187_v12 = vld [vmem:[#allocation7 + $0x8] sm:$0xff] }
 0x230   :  { %v521_v53 = vpop.f32.mrf.mxu3  ;;  %2021 = vmatmul.msk.f32.vlgmr.msra.gmra.mxu1 %vm214_vm0, %v187_v12  ;;  %v207_v8 = vld [vmem:[%s3144_s5 + $0x8] sm:$0xff] }
 0x231   :  { %v572_v54 = vmul.f32 1.442695, %v564_v52  ;;  %v531_v55 = vmul.f32 0.17677669, %v521_v53 }
 0x233   :  { %2156 = vpow2.f32 %v572_v54  ;;  %v539_v56 = vadd.f32 %v531_v55, %v197_v47 }
 0x235   :  { %v561_v58 = vsel %vm317_vm1, %v539_v56, -inf }
 0x236   :  { %562 = vmax.xlane.f32.xlu1 %v561_v58  ;;  %v213_v58 = vld [vmem:[%s3144_s5 + $0x38] sm:$0xff] }
 0x237   :  { %278 = vmatpush.msrb.mxu1 %v213_v58 }
 0x239   :  { %v2713_v60 = vpop.eup %2156  ;;  %279 = vmatpush.msrb.mxu1 %v211_v59 }
 0x23a   :  { %v588_v63 = vsel %vm317_vm1, %v2713_v60, 0.0 }
 0x23b   :  { %589 = vadd.xlane.f32.xlu0 %v588_v63  ;;  %v184_v63 = vld [vmem:[#allocation5] sm:$0xff] }
 0x23c   :  { %2018 = vmatmul.msk.f32.gmra.mxu0 %vm214_vm0, %v184_v63 }
 0x23e   :  { %553 = vmax.xlane.f32.xlu1 %v552_v0 }
 0x243   :  { %559 = vmax.xlane.f32.xlu0 %v558_v2 }
 0x246   :  { %2112 = vrot.lane.b32.xlu2 %v2111_v3, %s2502_s16 }
 0x291   :  { %v545_v14 = vpop.xlane.xlu2 %544 }
 0x292   :  { %v565_v15 = vsub.f32 %v533_v33, %v545_v14 }
 0x294   :  { %v574_v16 = vmul.f32 1.442695, %v565_v15 }
 0x296   :  { %2158 = vpow2.f32 %v574_v16 }
 0x299   :  { %v548_v17 = vpop.xlane.xlu2 %547  ;;  %v551_v18 = vpop.xlane.xlu1 %550 }
 0x29a   :  { %v566_v19 = vsub.f32 %v534_v39, %v548_v17  ;;  %v567_v20 = vsub.f32 %v535_v41, %v551_v18 }
 0x29c   :  { %v2725_v21 = vpop.eup %2158  ;;  %v576_v22 = vmul.f32 1.442695, %v566_v19  ;;  %v578_v23 = vmul.f32 1.442695, %v567_v20 }
 0x29d   :  { %v591_v24 = vsel %vm317_vm1, %v2725_v21, 0.0 }
 0x29e   :  { %2160 = vpow2.f32 %v576_v22  ;;  %592 = vadd.xlane.f32.xlu2 %v591_v24 }
 0x29f   :  { %2162 = vpow2.f32 %v578_v23 }
 0x2a1   :  { %v557_v6 = vpop.xlane.xlu2 %556 }
 0x2a2   :  { %v569_v9 = vsub.f32 %v537_v48, %v557_v6 }
 0x2a4   :  { %v2729_v25 = vpop.eup %2160  ;;  %v582_v26 = vmul.f32 1.442695, %v569_v9 }
 0x2a5   :  { %v2731_v27 = vpop.eup %2162  ;;  %v594_v28 = vsel %vm317_vm1, %v2729_v25, 0.0 }
 0x2a6   :  { %2164 = vpow2.f32 %v582_v26  ;;  %595 = vadd.xlane.f32.xlu0 %v594_v28  ;;  %v597_v29 = vsel %vm317_vm1, %v2731_v27, 0.0 }
 0x2a7   :  { %598 = vadd.xlane.f32.xlu2 %v597_v29 }
 0x2a9   :  { %v2113_v30 = vpop.permute.xlu2 %2112  ;;  %v563_v31 = vpop.xlane.xlu1 %562 }
 0x2aa   :  { %v2115_v32 = vunpack.i.h.bf16 %v2113_v30  ;;  %v2114_v33 = vunpack.i.l.bf16 %v2113_v30  ;;  %v571_v34 = vsub.f32 %v539_v56, %v563_v31 }
 0x2ac   :  { %v2737_v35 = vpop.eup %2164  ;;  %v586_v36 = vmul.f32 1.442695, %v571_v34  ;;  %753 = vmatpush.msra.mxu2 %v2115_v32  ;;  %779 = vmatpush.msra.mxu3 %v2114_v33 }
 0x2ad   :  { %v603_v37 = vsel %vm317_vm1, %v2737_v35, 0.0 }
 0x2ae   :  { %2166 = vpow2.f32 %v586_v36  ;;  %v590_v38 = vpop.xlane.xlu0 %589  ;;  %604 = vadd.xlane.f32.xlu1 %v603_v37 }
 0x2af   :  { %2168 = vrcp.f32 %v590_v38  ;;  %v623_v46 = vand.u32 2147483648, %v590_v38  ;;  %v621_v49 = vand.u32 2147483647, %v590_v38  ;;  %vm617_vm3 = vweird.f32 %v590_v38 }
 0x2b1   :  { %v624_v52 = vor.u32 1.1754944e-38, %v623_v46  ;;  %vm622_vm5 = vcmp.eq.f32.partialorder %v621_v49, 8.507059e+37  ;;  %v554_v11 = vpop.xlane.xlu1 %553 }
 0x2b4   :  { %v2741_v39 = vpop.eup %2166 }
 0x2b5   :  { %v2169_v40 = vpop.eup %2168  ;;  %v609_v41 = vsel %vm317_vm1, %v2741_v39, 0.0 }
 0x2b6   :  { %v613_v42 = vmul.f32 %v2169_v40, %v590_v38  ;;  %v560_v43 = vpop.xlane.xlu0 %559  ;;  %610 = vadd.xlane.f32.xlu1 %v609_v41  ;;  %vm618_vm2 = vweird.f32 %v2169_v40 }
 0x2b7   :  { %v570_v44 = vsub.f32 %v538_v1, %v560_v43  ;;  %vm619_vm4 = vmor %vm617_vm3, %vm618_vm2  ;;  %v185_v1 = vld [vmem:[#allocation5 + $0x8] sm:$0xff] }
 0x2b8   :  { %v614_v45 = vsub.f32 1.0, %v613_v42  ;;  %2019 = vmatmul.msk.f32.gmra.mxu0 %vm214_vm0, %v185_v1 }
 0x2b9   :  { %v584_v47 = vmul.f32 1.442695, %v570_v44 }
 0x2ba   :  { %v615_v48 = vmul.f32 %v2169_v40, %v614_v45 }
 0x2bb   :  { %2170 = vpow2.f32 %v584_v47 }
 0x2bc   :  { %v616_v50 = vadd.f32 %v2169_v40, %v615_v48 }
 0x2be   :  { %v620_v53 = vsel %vm619_vm4, %v2169_v40, %v616_v50 }
 0x2bf   :  { %v625_v54 = vsel %vm622_vm5, %v624_v52, %v620_v53  ;;  %2122 = vrot.lane.b32.xlu2 %v2121_v51, %s2502_s16 }
 0x2c0   :  { %v626_v55 = vmul.f32 %v2713_v60, %v625_v54 }
 0x2c1   :  { %v2749_v56 = vpop.eup %2170 }
 0x2c2   :  { %2044 = vmatmul.msk.f32.vlgmr.msra.gmra.mxu2 %vm317_vm1, %v626_v55  ;;  %v606_v57 = vsel %vm317_vm1, %v2749_v56, 0.0 }
 0x2c3   :  { %607 = vadd.xlane.f32.xlu0 %v606_v57 }
 0x2c7   :  { %836 = vrot.lane.b32.xlu2 %v2653_v7, %s2502_s16  ;;  %v209_v7 = vld [vmem:[%s3144_s5 + $0x18] sm:$0xff] }
 0x2c8   :  { %280 = vmatpush.msrb.mxu1 %v209_v7 }
 0x2ca   :  { %281 = vmatpush.msrb.mxu1 %v207_v8 }
 0x2cb   :  { %2022 = vmatmul.msk.f32.vlgmr.msrb.gmra.mxu1 %vm214_vm0, %v2639_v4 }
 0x2cf   :  { %862 = vrot.lane.b32.xlu1 %v2679_v13, %s2502_s16  ;;  %v568_v13 = vsub.f32 %v2715_v61, %v554_v11  ;;  %v186_v61 = vld [vmem:[#allocation7] sm:$0xff] }
 0x2d0   :  { %2020 = vmatmul.msk.f32.gmra.mxu0 %vm214_vm0, %v186_v61 }
 0x2d1   :  { %v580_v60 = vmul.f32 1.442695, %v568_v13 }
 0x2d3   :  { %2023 = vmatmul.msk.f32.gmra.mxu1 %vm214_vm0, %v2643_v5  ;;  %2172 = vpow2.f32 %v580_v60 }
 0x2d7   :  { %2117 = vrot.lane.b32.xlu0 %v2116_v10, %s2502_s16 }
 0x2d9   :  { %v2779_v62 = vpop.eup %2172 }
 0x2da   :  { %v600_v0 = vsel %vm317_vm1, %v2779_v62, 0.0 }
 0x2db   :  { %2024 = vmatmul.msk.f32.gmra.mxu1 %vm214_vm0, %v184_v63 }
 0x2e3   :  { %2025 = vmatmul.msk.f32.gmra.mxu1 %vm214_vm0, %v185_v1 }
 0x2eb   :  { %2026 = vmatmul.msk.f32.gmra.mxu1 %vm214_vm0, %v186_v61 }
 0x2f3   :  { %2027 = vmatmul.msk.f32.gmra.mxu1 %vm214_vm0, %v187_v12 }
 0x301   :  { %601 = vadd.xlane.f32.xlu0 %v600_v0 }
 0x311   :  { %v593_v2 = vpop.xlane.xlu2 %592 }
 0x312   :  { %2174 = vrcp.f32 %v593_v2  ;;  %v638_v17 = vand.u32 2147483648, %v593_v2  ;;  %v636_v19 = vand.u32 2147483647, %v593_v2  ;;  %vm632_vm7 = vweird.f32 %v593_v2 }
 0x314   :  { %v639_v22 = vor.u32 1.1754944e-38, %v638_v17  ;;  %vm637_vm9 = vcmp.eq.f32.partialorder %v636_v19, 8.507059e+37 }
 0x318   :  { %v2175_v3 = vpop.eup %2174 }
 0x319   :  { %v628_v14 = vmul.f32 %v2175_v3, %v593_v2  ;;  %vm633_vm6 = vweird.f32 %v2175_v3  ;;  %v2796_v30 = vpop.xlane.xlu0 %595 }
 0x31a   :  { %v2790_v15 = vpop.xlane.xlu2 %598  ;;  %vm634_vm8 = vmor %vm632_vm7, %vm633_vm6  ;;  %vm647_vm14 = vweird.f32 %v2796_v30  ;;  %v653_v10 = vand.u32 2147483648, %v2796_v30  ;;  %v651_v63 = vand.u32 2147483647, %v2796_v30 }
 0x31b   :  { %v629_v16 = vsub.f32 1.0, %v628_v14  ;;  %v668_v8 = vand.u32 2147483648, %v2790_v15  ;;  %vm662_vm5 = vweird.f32 %v2790_v15  ;;  %v666_v0 = vand.u32 2147483647, %v2790_v15 }
 0x31c   :  { %v654_v17 = vor.u32 1.1754944e-38, %v653_v10  ;;  %v300_v10 = vld [vmem:[%s3145_s6 + $0x18] sm:$0xff] }
 0x31d   :  { %v630_v18 = vmul.f32 %v2175_v3, %v629_v16 }
 0x31f   :  { %v631_v20 = vadd.f32 %v2175_v3, %v630_v18 }
 0x321   :  { %v635_v23 = vsel %vm634_vm8, %v2175_v3, %v631_v20  ;;  %v2792_v24 = vpop.xlane.xlu1 %604 }
 0x322   :  { %v640_v6 = vsel %vm637_vm9, %v639_v22, %v635_v23  ;;  %v2123_v9 = vpop.permute.xlu2 %2122 }
 0x323   :  { %v2125_v26 = vunpack.i.h.bf16 %v2123_v9  ;;  %v2124_v28 = vunpack.i.l.bf16 %v2123_v9  ;;  %v641_v29 = vmul.f32 %v2725_v21, %v640_v6 }
 0x325   :  { %935 = vmatpush.msra.mxu1 %v2125_v26  ;;  %909 = vmatpush.msrb.mxu0 %v2124_v28  ;;  %v698_v26 = vand.u32 2147483648, %v2792_v24 }
 0x326   :  { %2045 = vmatmul.msk.f32.vlgmr.msra.gmra.mxu3 %vm317_vm1, %v641_v29 }
 0x329   :  { %v611_v31 = vpop.xlane.xlu1 %610 }
 0x32a   :  { %2176 = vrcp.f32 %v611_v31  ;;  %v728_v38 = vand.u32 2147483648, %v611_v31  ;;  %v726_v42 = vand.u32 2147483647, %v611_v31  ;;  %vm722_vm11 = vweird.f32 %v611_v31 }
 0x32b   :  { %2178 = vrcp.f32 %v2796_v30 }
 0x32c   :  { %2180 = vrcp.f32 %v2790_v15  ;;  %v729_v45 = vor.u32 1.1754944e-38, %v728_v38  ;;  %vm727_vm13 = vcmp.eq.f32.partialorder %v726_v42, 8.507059e+37 }
 0x32d   :  { %2182 = vrcp.f32 %v2792_v24 }
 0x330   :  { %v2177_v32 = vpop.eup %2176 }
 0x331   :  { %v2800_v33 = vpop.eup %2178  ;;  %v718_v34 = vmul.f32 %v2177_v32, %v611_v31  ;;  %vm723_vm10 = vweird.f32 %v2177_v32 }
 0x332   :  { %v2802_v36 = vpop.eup %2180  ;;  %v643_v21 = vmul.f32 %v2800_v33, %v2796_v30  ;;  %vm724_vm12 = vmor %vm722_vm11, %vm723_vm10  ;;  %vm648_vm15 = vweird.f32 %v2800_v33  ;;  %vm652_vm10 = vcmp.eq.f32.partialorder %v651_v63, 8.507059e+37  ;;  %vm667_vm11 = vcmp.eq.f32.partialorder %v666_v0, 8.507059e+37 }
 0x333   :  { %v719_v37 = vsub.f32 1.0, %v718_v34  ;;  %v658_v40 = vmul.f32 %v2802_v36, %v2790_v15  ;;  %v2809_v49 = vpop.eup %2182  ;;  %vm663_vm2 = vweird.f32 %v2802_v36  ;;  %vm2824_vm4 = vmor %vm647_vm14, %vm648_vm15  ;;  %v669_v15 = vor.u32 1.1754944e-38, %v668_v8 }
 0x334   :  { %v644_v46 = vsub.f32 1.0, %v643_v21  ;;  %v688_v55 = vmul.f32 %v2809_v49, %v2792_v24  ;;  %vm2831_vm6 = vmor %vm662_vm5, %vm663_vm2  ;;  %v696_v30 = vand.u32 2147483647, %v2792_v24 }
 0x335   :  { %v720_v41 = vmul.f32 %v2177_v32, %v719_v37  ;;  %v659_v47 = vsub.f32 1.0, %v658_v40 }
 0x336   :  { %v608_v43 = vpop.xlane.xlu0 %607  ;;  %v645_v53 = vmul.f32 %v2800_v33, %v644_v46  ;;  %v689_v59 = vsub.f32 1.0, %v688_v55  ;;  %vm697_vm15 = vcmp.eq.f32.partialorder %v696_v30, 8.507059e+37 }
 0x337   :  { %v721_v44 = vadd.f32 %v2177_v32, %v720_v41  ;;  %2184 = vrcp.f32 %v608_v43  ;;  %v660_v54 = vmul.f32 %v2802_v36, %v659_v47  ;;  %v713_v7 = vand.u32 2147483648, %v608_v43 }
 0x338   :  { %v646_v12 = vadd.f32 %v2800_v33, %v645_v53  ;;  %v711_v13 = vand.u32 2147483647, %v608_v43  ;;  %vm707_vm7 = vweird.f32 %v608_v43  ;;  %v690_v14 = vmul.f32 %v2809_v49, %v689_v59 }
 0x339   :  { %v725_v48 = vsel %vm724_vm12, %v2177_v32, %v721_v44  ;;  %v661_v58 = vadd.f32 %v2802_v36, %v660_v54  ;;  %v714_v16 = vor.u32 1.1754944e-38, %v713_v7  ;;  %vm693_vm12 = vweird.f32 %v2809_v49 }
 0x33a   :  { %v730_v50 = vsel %vm727_vm13, %v729_v45, %v725_v48  ;;  %v650_v2 = vsel %vm2824_vm4, %v2800_v33, %v646_v12  ;;  %vm712_vm9 = vcmp.eq.f32.partialorder %v711_v13, 8.507059e+37  ;;  %v691_v6 = vadd.f32 %v2809_v49, %v690_v14  ;;  %v837_v33 = vpop.permute.xlu2 %836  ;;  %v297_v12 = vld [vmem:[%s3145_s6] sm:$0xff] }
 0x33b   :  { %v731_v51 = vmul.f32 %v2741_v39, %v730_v50  ;;  %v665_v3 = vsel %vm2831_vm6, %v2802_v36, %v661_v58  ;;  %v655_v20 = vsel %vm652_vm10, %v654_v17, %v650_v2  ;;  %vm692_vm13 = vweird.f32 %v2792_v24 }
 0x33c   :  { %v670_v22 = vsel %vm667_vm11, %v669_v15, %v665_v3  ;;  %v656_v31 = vmul.f32 %v2729_v25, %v655_v20  ;;  %vm694_vm14 = vmor %vm692_vm13, %vm693_vm12  ;;  %v699_v36 = vor.u32 1.1754944e-38, %v698_v26  ;;  %vm966_vm6 = vcmask 130048  }
 0x33d   :  { %v2185_v52 = vpop.eup %2184  ;;  %2051 = vmatmul.msk.f32.vlgmr.msra.gmra.mxu1 %vm317_vm1, %v731_v51  ;;  %v671_v32 = vmul.f32 %v2731_v27, %v670_v22  ;;  %v264_v27 = vpop.f32.mrf.mxu1  ;;  %v2896_v22 = vld [vmem:[#allocation16] sm:$0xff] }
 0x33e   :  { %v703_v57 = vmul.f32 %v2185_v52, %v608_v43  ;;  %vm708_vm3 = vweird.f32 %v2185_v52  ;;  %v1061_v27 = vld [vmem:[#allocation11] sm:$0xff] }
 0x33f   :  { %vm709_vm8 = vmor %vm707_vm7, %vm708_vm3  ;;  %vm969_vm7 = vcmask 195584  }
 0x340   :  { %v704_v39 = vsub.f32 1.0, %v703_v57 }
 0x341   :  { %v863_v34 = vpop.permute.xlu1 %862 }
 0x342   :  { %v705_v11 = vmul.f32 %v2185_v52, %v704_v39  ;;  %v298_v39 = vld [vmem:[%s3145_s6 + $0x8] sm:$0xff] }
 0x344   :  { %v706_v61 = vadd.f32 %v2185_v52, %v705_v11 }
 0x345   :  { %v755_v58 = vpop.f32.mrf.mxu2 }
 0x346   :  { %v710_v18 = vsel %vm709_vm8, %v2185_v52, %v706_v61  ;;  %v2858_v52 = vpop.f32.mrf.mxu0 }
 0x347   :  { %v715_v19 = vsel %vm712_vm9, %v714_v16, %v710_v18 }
 0x348   :  { %v716_v23 = vmul.f32 %v2749_v56, %v715_v19  ;;  %v695_v56 = vsel %vm694_vm14, %v2809_v49, %v691_v6  ;;  %v283_v37 = vpop.f32.mrf.mxu1 }
 0x349   :  { %v2118_v9 = vpop.permute.xlu0 %2117  ;;  %v700_v24 = vsel %vm697_vm15, %v699_v36, %v695_v56  ;;  %v2505_v56 = vmov 32.0   ;;  %v1064_v36 = vld [vmem:[#allocation11 + $0x18] sm:$0xff] }
 0x34a   :  { %v2120_v28 = vunpack.i.h.bf16 %v2118_v9  ;;  %v2119_v29 = vunpack.i.l.bf16 %v2118_v9  ;;  %2050 = vmatmul.msk.f32.vlgmr.msrb.gmra.mxu0 %vm317_vm1, %v716_v23  ;;  %v701_v25 = vmul.f32 %v2737_v35, %v700_v24  ;;  %v972_v23 = vperm.slane %v2896_v22, 0  ;;  %v1063_v24 = vld [vmem:[#allocation11 + $0x10] sm:$0xff] }
 0x34c   :  { %805 = vmatpush.msrb.mxu2 %v2120_v28  ;;  %831 = vmatpush.msrb.mxu3 %v2119_v29 }
 0x34d   :  { %2046 = vmatmul.msk.f32.vlgmr.msrb.gmra.mxu2 %vm317_vm1, %v656_v31  ;;  %2047 = vmatmul.msk.f32.vlgmr.msrb.gmra.mxu3 %vm317_vm1, %v671_v32 }
 0x34e   :  { %857 = vmatpush.msra.mxu2 %v837_v33  ;;  %883 = vmatpush.msra.mxu3 %v863_v34  ;;  %v2864_v54 = vpop.f32.mrf.mxu0 }
 0x350   :  { %v285_v21 = vpop.f32.mrf.mxu1  ;;  %991 = vmatpush.msrb.mxu2 %v300_v10  ;;  %1083 = vmatpush.msrb.mxu3 %v1064_v36 }
 0x352   :  { %1084 = vmatpush.msrb.mxu3 %v1063_v24 }
 0x355   :  { %2049 = vmatmul.msk.f32.vlgmr.msra.gmra.mxu3 %vm317_vm1, %v701_v25  ;;  %v1062_v25 = vld [vmem:[#allocation11 + $0x8] sm:$0xff] }
 0x356   :  { %v262_v55 = vpop.f32.mrf.mxu0  ;;  %1085 = vmatpush.msrb.mxu3 %v1062_v25 }
 0x358   :  { %v287_v42 = vpop.f32.mrf.mxu1  ;;  %1086 = vmatpush.msrb.mxu3 %v1061_v27 }
 0x360   :  { %v289_v49 = vpop.f32.mrf.mxu1 }
 0x368   :  { %v2860_v53 = vpop.f32.mrf.mxu1 }
 0x369   :  { %2056 = vmatpush.xpose.msk.msra.mxu0 %vm317_vm1, %v2860_v53 }
 0x370   :  { %v2879_v59 = vpop.f32.mrf.mxu1 }
 0x374   :  { %v602_v38 = vpop.xlane.xlu0 %601 }
 0x375   :  { %2186 = vrcp.f32 %v602_v38  ;;  %v683_v44 = vand.u32 2147483648, %v602_v38  ;;  %v681_v46 = vand.u32 2147483647, %v602_v38  ;;  %vm677_vm3 = vweird.f32 %v602_v38 }
 0x376   :  { %2188 = vrcp.f32 %v2505_v56 }
 0x377   :  { %v684_v48 = vor.u32 1.1754944e-38, %v683_v44  ;;  %vm682_vm5 = vcmp.eq.f32.partialorder %v681_v46, 8.507059e+37 }
 0x37b   :  { %v2187_v40 = vpop.eup %2186 }
 0x37c   :  { %v673_v41 = vmul.f32 %v2187_v40, %v602_v38  ;;  %vm678_vm2 = vweird.f32 %v2187_v40  ;;  %v2189_v33 = vpop.eup %2188 }
 0x37d   :  { %vm679_vm4 = vmor %vm677_vm3, %vm678_vm2  ;;  %v1011_v34 = vmul.f32 32.0, %v2189_v33  ;;  %vm1015_vm8 = vweird.f32 %v2189_v33 }
 0x37e   :  { %v674_v43 = vsub.f32 1.0, %v673_v41 }
 0x380   :  { %v675_v45 = vmul.f32 %v2187_v40, %v674_v43 }
 0x382   :  { %v676_v47 = vadd.f32 %v2187_v40, %v675_v45 }
 0x384   :  { %v680_v35 = vsel %vm679_vm4, %v2187_v40, %v676_v47 }
 0x385   :  { %v685_v50 = vsel %vm682_vm5, %v684_v48, %v680_v35 }
 0x386   :  { %v686_v51 = vmul.f32 %v2779_v62, %v685_v50  ;;  %v299_v62 = vld [vmem:[%s3145_s6 + $0x10] sm:$0xff]  ;;  %s2506_s6 = smov 32  }
 0x387   :  { %992 = vmatpush.msrb.mxu2 %v299_v62 }
 0x388   :  { %2048 = vmatmul.msk.f32.vlgmr.msra.gmra.mxu2 %vm317_vm1, %v686_v51 }
 0x389   :  { %993 = vmatpush.msrb.mxu2 %v298_v39 }
 0x38b   :  { %994 = vmatpush.msrb.mxu2 %v297_v12 }
 0x38d   :  { %2064 = vmatpush.xpose.msk.msra.mxu2 %vm317_vm1, %v2879_v59 }
 0x3a9   :  { %v781_v57 = vpop.f32.mrf.mxu3 }
 0x3aa   :  { %942 = vrot.lane.b32.xlu1 %v781_v57, %s2489_s30 }
 0x3ba   :  { %v937_v60 = vpop.f32.mrf.mxu1 }
 0x3c7   :  { %v911_v11 = vpop.f32.mrf.mxu0 }
 0x3d0   :  { %v807_v7 = vpop.f32.mrf.mxu2  ;;  %v833_v8 = vpop.f32.mrf.mxu3 }
 0x3d1   :  { %950 = vrot.lane.b32.xlu2 %v807_v7, %s2503_s9  ;;  %958 = vrot.lane.b32.xlu1 %v833_v8, %s2504_s25 }
 0x3d8   :  { %v885_v13 = vpop.f32.mrf.mxu3 }
 0x3d9   :  { %944 = vrot.lane.b32.xlu2 %v885_v13, %s2489_s30  ;;  %952 = vrot.lane.b32.xlu1 %v911_v11, %s2503_s9 }
 0x3e1   :  { %960 = vrot.lane.b32.xlu2 %v937_v60, %s2504_s25 }
 0x40b   :  { %v859_v16 = vpop.f32.mrf.mxu2 }
 0x41c   :  { %v943_v0 = vpop.permute.xlu1 %942 }
 0x41d   :  { %v964_v1 = vsel %vm317_vm1, %v755_v58, %v943_v0 }
 0x42b   :  { %v951_v63 = vpop.permute.xlu2 %950 }
 0x42c   :  { %v967_v2 = vsel %vm966_vm6, %v964_v1, %v951_v63  ;;  %v1058_v1 = vperm.slane %v2896_v22, 2 }
 0x433   :  { %v945_v61 = vpop.permute.xlu2 %944 }
 0x434   :  { %v965_v17 = vsel %vm317_vm1, %v859_v16, %v945_v61 }
 0x43b   :  { %v961_v18 = vpop.permute.xlu2 %960 }
 0x443   :  { %v959_v3 = vpop.permute.xlu1 %958 }
 0x444   :  { %v970_v14 = vsel %vm969_vm7, %v967_v2, %v959_v3 }
 0x445   :  { %2052 = vmatmul.msk.f32.vlgmr.msrb.gmra.mxu2 %vm214_vm0, %v970_v14 }
 0x44b   :  { %v953_v15 = vpop.permute.xlu1 %952 }
 0x44c   :  { %v968_v19 = vsel %vm966_vm6, %v965_v17, %v953_v15 }
 0x44d   :  { %v971_v20 = vsel %vm969_vm7, %v968_v19, %v961_v18 }
 0x44e   :  { %2053 = vmatmul.msk.f32.gmra.mxu2 %vm214_vm0, %v971_v20 }
 0x4c8   :  { %v996_v6 = vpop.f32.mrf.mxu2 }
 0x4c9   :  { %v997_v9 = vadd.f32 %v996_v6, %v972_v23 }
 0x4cb   :  { %v1002_v26 = vadd.f32 %v997_v9, %v2639_v4  ;;  %v1012_v4 = vsub.f32 1.0, %v1011_v34  ;;  %v198_v34 = vld [vmem:[#allocation10] sm:$0xff] }
 0x4cc   :  { %v200_v36 = vcvt.s32.f32 %v198_v34 }
 0x4cd   :  { %v1004_v28 = vsel %vm214_vm0, %v1002_v26, 0.0  ;;  %v1013_v37 = vmul.f32 %v2189_v33, %v1012_v4 }
 0x4ce   :  { %1005 = vadd.xlane.f32.xlu1 %v1004_v28  ;;  %v2014_v24 = vadd.f32 -1.0, %v200_v36 }
 0x4d0   :  { %v204_v27 = vmul.f32 1e+20, %v2014_v24 }
 0x4d1   :  { %v999_v29 = vpop.f32.mrf.mxu2 }
 0x4d2   :  { %v1000_v30 = vadd.f32 %v999_v29, %v972_v23 }
 0x4d4   :  { %v1003_v31 = vadd.f32 %v1000_v30, %v2643_v5  ;;  %v1014_v5 = vadd.f32 %v2189_v33, %v1013_v37 }
 0x4d6   :  { %v1007_v32 = vsel %vm214_vm0, %v1003_v31, 0.0  ;;  %v2905_v21 = vsel %vm1015_vm8, %v2189_v33, %v1014_v5 }
 0x4d7   :  { %1008 = vadd.xlane.f32.xlu2 %v1007_v32 }
 0x4e7   :  { %1116 = vrot.lane.b32.xlu1 %v2879_v59, %s2499_s0 }
 0x541   :  { %v1006_v38 = vpop.xlane.xlu1 %1005 }
 0x542   :  { %v1017_v40 = vmul.f32 %v2905_v21, %v1006_v38 }
 0x544   :  { %v1019_v41 = vsub.f32 %v1002_v26, %v1017_v40 }
 0x546   :  { %v1021_v42 = vmul.f32 %v1019_v41, %v1019_v41 }
 0x548   :  { %v1023_v43 = vsel %vm214_vm0, %v1021_v42, 0.0 }
 0x549   :  { %1024 = vadd.xlane.f32.xlu0 %v1023_v43 }
 0x54a   :  { %v1009_v44 = vpop.xlane.xlu2 %1008 }
 0x54b   :  { %v1018_v45 = vmul.f32 %v2905_v21, %v1009_v44 }
 0x54d   :  { %v1020_v46 = vsub.f32 %v1003_v31, %v1018_v45 }
 0x54f   :  { %v1022_v47 = vmul.f32 %v1020_v46, %v1020_v46 }
 0x551   :  { %v1026_v48 = vsel %vm214_vm0, %v1022_v47, 0.0 }
 0x552   :  { %1027 = vadd.xlane.f32.xlu0 %v1026_v48 }
 0x559   :  { %v1117_v35 = vpop.permute.xlu1 %1116 }
 0x55a   :  { %2066 = vmatpush.xpose.msk.msra.mxu3 %vm317_vm1, %v1117_v35 }
 0x566   :  { %1114 = vrot.lane.b32.xlu0 %v2860_v53, %s2499_s0 }
 0x56e   :  { %1118 = vrot.lane.b32.xlu0 %v2860_v53, %s2500_s14 }
 0x576   :  { %1122 = vrot.lane.b32.xlu0 %v2860_v53, %s2498_s13  ;;  %v1055_v53 = vperm.slane %v2896_v22, 1 }
 0x5bc   :  { %v1025_v49 = vpop.xlane.xlu0 %1024 }
 0x5bd   :  { %v1029_v50 = vmul.f32 %v1025_v49, %v2905_v21 }
 0x5bf   :  { %v1031_v51 = vadd.f32 1e-05, %v1029_v50  ;;  %v199_v50 = vld [vmem:[#allocation10 + $0x8] sm:$0xff] }
 0x5c1   :  { %2190 = vrsqrt.f32 %v1031_v51  ;;  %vm1039_vm10 = vweird.f32 %v1031_v51 }
 0x5c5   :  { %v1028_v55 = vpop.xlane.xlu0 %1027 }
 0x5c6   :  { %v1030_v57 = vmul.f32 %v1028_v55, %v2905_v21 }
 0x5c7   :  { %v2191_v10 = vpop.eup %2190 }
 0x5c8   :  { %v1034_v62 = vmul.f32 %v2191_v10, %v1031_v51  ;;  %v1032_v39 = vadd.f32 1e-05, %v1030_v57  ;;  %vm1040_vm9 = vweird.f32 %v2191_v10  ;;  %v201_v51 = vcvt.s32.f32 %v199_v50 }
 0x5c9   :  { %vm1041_vm11 = vmor %vm1039_vm10, %vm1040_vm9 }
 0x5ca   :  { %v1035_v12 = vmul.f32 %v2191_v10, %v1034_v62  ;;  %2192 = vrsqrt.f32 %v1032_v39  ;;  %vm1049_vm13 = vweird.f32 %v1032_v39  ;;  %v2015_v55 = vadd.f32 -1.0, %v201_v51 }
 0x5cc   :  { %v1036_v58 = vmul.f32 0.5, %v1035_v12  ;;  %v205_v62 = vmul.f32 1e+20, %v2015_v55 }
 0x5ce   :  { %v1037_v7 = vsub.f32 1.5, %v1036_v58 }
 0x5d0   :  { %v2193_v8 = vpop.eup %2192  ;;  %v1038_v11 = vmul.f32 %v2191_v10, %v1037_v7 }
 0x5d1   :  { %v1044_v13 = vmul.f32 %v2193_v8, %v1032_v39  ;;  %vm1050_vm12 = vweird.f32 %v2193_v8 }
 0x5d2   :  { %v1042_v60 = vsel %vm1041_vm11, %v2191_v10, %v1038_v11  ;;  %vm1051_vm14 = vmor %vm1049_vm13, %vm1050_vm12 }
 0x5d3   :  { %v1053_v63 = vmul.f32 %v1042_v60, %v1019_v41  ;;  %v1045_v0 = vmul.f32 %v2193_v8, %v1044_v13 }
 0x5d5   :  { %v1056_v61 = vmul.f32 %v1055_v53, %v1053_v63  ;;  %v1046_v2 = vmul.f32 0.5, %v1045_v0  ;;  %v2126_v0 = vpack.i.bf16 %v2864_v54, %v2858_v52 }
 0x5d7   :  { %v1047_v3 = vsub.f32 1.5, %v1046_v2  ;;  %v2922_v14 = vadd.f32 %v1058_v1, %v1056_v61 }
 0x5d8   :  { %v1115_v16 = vpop.permute.xlu0 %1114 }
 0x5d9   :  { %v1048_v17 = vmul.f32 %v2193_v8, %v1047_v3  ;;  %2054 = vmatmul.msk.f32.vlgmr.msrb.gmra.mxu3 %vm214_vm0, %v2922_v14  ;;  %2058 = vmatpush.xpose.msk.msrb.mxu1 %vm317_vm1, %v1115_v16 }
 0x5db   :  { %v1052_v15 = vsel %vm1051_vm14, %v2193_v8, %v1048_v17 }
 0x5dc   :  { %v1054_v18 = vmul.f32 %v1052_v15, %v1020_v46 }
 0x5de   :  { %v1057_v19 = vmul.f32 %v1055_v53, %v1054_v18 }
 0x5e0   :  { %v1119_v20 = vpop.permute.xlu0 %1118  ;;  %v2927_v23 = vadd.f32 %v1058_v1, %v1057_v19 }
 0x5e1   :  { %2060 = vmatpush.xpose.msk.msrb.mxu0 %vm317_vm1, %v1119_v20 }
 0x5e2   :  { %2055 = vmatmul.msk.f32.gmra.mxu3 %vm214_vm0, %v2927_v23 }
 0x5e8   :  { %v1123_v6 = vpop.permute.xlu0 %1122 }
 0x5e9   :  { %2062 = vmatpush.xpose.msk.msra.mxu1 %vm317_vm1, %v1123_v6 }
 0x65c   :  { %v1088_v9 = vpop.f32.mrf.mxu3 }
 0x65d   :  { %1104 = vrot.lane.b32.xlu1 %v1088_v9, %s2500_s14  ;;  %1100 = vrot.lane.b32.xlu2 %v1088_v9, %s2499_s0 }
 0x65e   :  { %2057 = vmatmul.msk.f32.vlgmr.msra.gmra.mxu0 %vm317_vm1, %v1088_v9 }
 0x665   :  { %1124 = vrot.lane.b32.xlu1 %v2879_v59, %s2498_s13  ;;  %1108 = vrot.lane.b32.xlu2 %v1088_v9, %s2498_s13  ;;  %v1091_v26 = vpop.f32.mrf.mxu3 }
 0x666   :  { %1102 = vrot.lane.b32.xlu0 %v1091_v26, %s2499_s0  ;;  %2065 = vmatmul.msk.f32.vlgmr.msra.gmra.mxu2 %vm317_vm1, %v1091_v26 }
 0x66d   :  { %1106 = vrot.lane.b32.xlu2 %v1091_v26, %s2500_s14 }
 0x66e   :  { %1120 = vrot.lane.b32.xlu0 %v2879_v59, %s2500_s14 }
 0x676   :  { %1110 = vrot.lane.b32.xlu0 %v1091_v26, %s2498_s13 }
 0x6b7   :  { %v1101_v28 = vpop.permute.xlu2 %1100 }
 0x6b8   :  { %2059 = vmatmul.msk.f32.vlgmr.msrb.gmra.mxu1 %vm317_vm1, %v1101_v28 }
 0x6bf   :  { %v1109_v29 = vpop.permute.xlu2 %1108 }
 0x6c0   :  { %2063 = vmatmul.msk.f32.vlgmr.msra.gmra.mxu1 %vm317_vm1, %v1109_v29 }
 0x6c7   :  { %v1107_v59 = vpop.permute.xlu2 %1106 }
 0x6cf   :  { %v1105_v30 = vpop.permute.xlu1 %1104 }
 0x6d0   :  { %2061 = vmatmul.msk.f32.vlgmr.msrb.gmra.mxu0 %vm317_vm1, %v1105_v30 }
 0x6d7   :  { %v1125_v31 = vpop.permute.xlu1 %1124 }
 0x6d8   :  { %v1103_v32 = vpop.permute.xlu0 %1102  ;;  %2070 = vmatpush.xpose.msk.msrb.mxu1 %vm317_vm1, %v1125_v31 }
 0x6d9   :  { %2067 = vmatmul.msk.f32.vlgmr.msra.gmra.mxu3 %vm317_vm1, %v1103_v32 }
 0x6db   :  { %v1161_v41 = vpop.f32.mrf.mxu0 }
 0x6dc   :  { %v1332_v43 = vmul.f32 0.17677669, %v1161_v41 }
 0x6de   :  { %v2955_v45 = vadd.f32 %v1332_v43, %v204_v27 }
 0x6e0   :  { %v1121_v56 = vpop.permute.xlu0 %1120  ;;  %v1348_v46 = vsel %vm317_vm1, %v2955_v45, -inf }
 0x6e1   :  { %2068 = vmatpush.xpose.msk.msra.mxu0 %vm317_vm1, %v1121_v56 }
 0x6e4   :  { %2069 = vmatmul.msk.f32.vlgmr.msra.gmra.mxu0 %vm317_vm1, %v1107_v59 }
 0x6e8   :  { %v1111_v33 = vpop.permute.xlu0 %1110 }
 0x6e9   :  { %2071 = vmatmul.msk.f32.vlgmr.msrb.gmra.mxu1 %vm317_vm1, %v1111_v33  ;;  %v1257_v1 = vpop.f32.mrf.mxu2 }
 0x6ea   :  { %v1336_v61 = vmul.f32 0.17677669, %v1257_v1 }
 0x6ec   :  { %v2968_v2 = vadd.f32 %v1336_v61, %v205_v62 }
 0x6ee   :  { %v1360_v3 = vsel %vm317_vm1, %v2968_v2, -inf }
 0x735   :  { %v1185_v4 = vpop.f32.mrf.mxu1 }
 0x736   :  { %v1333_v25 = vmul.f32 0.17677669, %v1185_v4 }
 0x738   :  { %v1341_v37 = vadd.f32 %v1333_v25, %v204_v27 }
 0x73a   :  { %v1351_v5 = vsel %vm317_vm1, %v1341_v37, -inf }
 0x73b   :  { %1352 = vmax.xlane.f32.xlu1 %v1351_v5 }
 0x73d   :  { %v1233_v38 = vpop.f32.mrf.mxu1 }
 0x73e   :  { %v1335_v40 = vmul.f32 0.17677669, %v1233_v38 }
 0x740   :  { %v1343_v42 = vadd.f32 %v1335_v40, %v204_v27 }
 0x742   :  { %v1357_v44 = vsel %vm317_vm1, %v1343_v42, -inf }
 0x743   :  { %1358 = vmax.xlane.f32.xlu0 %v1357_v44 }
 0x74b   :  { %1349 = vmax.xlane.f32.xlu0 %v1348_v46 }
 0x74d   :  { %v1209_v47 = vpop.f32.mrf.mxu0 }
 0x74e   :  { %v1334_v48 = vmul.f32 0.17677669, %v1209_v47 }
 0x750   :  { %v1342_v35 = vadd.f32 %v1334_v48, %v204_v27 }
 0x752   :  { %v1354_v49 = vsel %vm317_vm1, %v1342_v35, -inf }
 0x753   :  { %1355 = vmax.xlane.f32.xlu2 %v1354_v49 }
 0x75c   :  { %v1281_v57 = vpop.f32.mrf.mxu3 }
 0x75d   :  { %v1337_v10 = vmul.f32 0.17677669, %v1281_v57 }
 0x75f   :  { %v1345_v39 = vadd.f32 %v1337_v10, %v205_v62 }
 0x761   :  { %v1305_v12 = vpop.f32.mrf.mxu0  ;;  %v1363_v58 = vsel %vm317_vm1, %v1345_v39, -inf }
 0x762   :  { %v1338_v7 = vmul.f32 0.17677669, %v1305_v12  ;;  %1364 = vmax.xlane.f32.xlu1 %v1363_v58 }
 0x764   :  { %v1346_v8 = vadd.f32 %v1338_v7, %v205_v62 }
 0x766   :  { %v1329_v11 = vpop.f32.mrf.mxu1  ;;  %v1366_v53 = vsel %vm317_vm1, %v1346_v8, -inf }
 0x767   :  { %v1339_v13 = vmul.f32 0.17677669, %v1329_v11  ;;  %1367 = vmax.xlane.f32.xlu2 %v1366_v53 }
 0x769   :  { %v1347_v60 = vadd.f32 %v1339_v13, %v205_v62 }
 0x76b   :  { %v1369_v63 = vsel %vm317_vm1, %v1347_v60, -inf }
 0x76c   :  { %1370 = vmax.xlane.f32.xlu0 %v1369_v63 }
 0x77b   :  { %2127 = vrot.lane.b32.xlu1 %v2126_v0, %s2499_s0 }
 0x77f   :  { %2132 = vrot.lane.b32.xlu2 %v2126_v0, %s2500_s14 }
 0x780   :  { %2137 = vrot.lane.b32.xlu0 %v2126_v0, %s2498_s13 }
 0x7a5   :  { %1361 = vmax.xlane.f32.xlu1 %v1360_v3 }
 0x7ae   :  { %v1353_v16 = vpop.xlane.xlu1 %1352 }
 0x7af   :  { %v1373_v17 = vsub.f32 %v1341_v37, %v1353_v16 }
 0x7b1   :  { %v1382_v15 = vmul.f32 1.442695, %v1373_v17 }
 0x7b3   :  { %2194 = vpow2.f32 %v1382_v15 }
 0x7b6   :  { %v1359_v18 = vpop.xlane.xlu0 %1358 }
 0x7b7   :  { %v1375_v19 = vsub.f32 %v1343_v42, %v1359_v18 }
 0x7b9   :  { %v2972_v20 = vpop.eup %2194  ;;  %v1386_v6 = vmul.f32 1.442695, %v1375_v19 }
 0x7ba   :  { %v1399_v9 = vsel %vm317_vm1, %v2972_v20, 0.0 }
 0x7bb   :  { %2196 = vpow2.f32 %v1386_v6  ;;  %1400 = vadd.xlane.f32.xlu2 %v1399_v9 }
 0x7be   :  { %v1350_v34 = vpop.xlane.xlu0 %1349 }
 0x7bf   :  { %v1372_v12 = vsub.f32 %v2955_v45, %v1350_v34 }
 0x7c1   :  { %v2976_v26 = vpop.eup %2196  ;;  %v1380_v58 = vmul.f32 1.442695, %v1372_v12 }
 0x7c2   :  { %v1405_v28 = vsel %vm317_vm1, %v2976_v26, 0.0 }
 0x7c3   :  { %1406 = vadd.xlane.f32.xlu1 %v1405_v28 }
 0x7c6   :  { %v1356_v29 = vpop.xlane.xlu2 %1355 }
 0x7c7   :  { %v1374_v30 = vsub.f32 %v1342_v35, %v1356_v29 }
 0x7c9   :  { %v1384_v31 = vmul.f32 1.442695, %v1374_v30 }
 0x7cb   :  { %2198 = vpow2.f32 %v1384_v31 }
 0x7d1   :  { %v2980_v32 = vpop.eup %2198 }
 0x7d2   :  { %v1402_v56 = vsel %vm317_vm1, %v2980_v32, 0.0 }
 0x7d3   :  { %1403 = vadd.xlane.f32.xlu0 %v1402_v56 }
 0x7d5   :  { %v1365_v59 = vpop.xlane.xlu1 %1364 }
 0x7d6   :  { %v1377_v33 = vsub.f32 %v1345_v39, %v1365_v59 }
 0x7d8   :  { %v1390_v36 = vmul.f32 1.442695, %v1377_v33 }
 0x7da   :  { %2200 = vpow2.f32 %v1390_v36  ;;  %v1368_v24 = vpop.xlane.xlu2 %1367 }
 0x7db   :  { %v1378_v4 = vsub.f32 %v1346_v8, %v1368_v24 }
 0x7dd   :  { %v1392_v25 = vmul.f32 1.442695, %v1378_v4 }
 0x7df   :  { %2202 = vpow2.f32 %v1392_v25  ;;  %v1371_v27 = vpop.xlane.xlu0 %1370 }
 0x7e0   :  { %v2984_v37 = vpop.eup %2200  ;;  %v1379_v5 = vsub.f32 %v1347_v60, %v1371_v27 }
 0x7e1   :  { %v1411_v38 = vsel %vm317_vm1, %v2984_v37, 0.0 }
 0x7e2   :  { %v1394_v40 = vmul.f32 1.442695, %v1379_v5  ;;  %1412 = vadd.xlane.f32.xlu2 %v1411_v38  ;;  %v2133_v47 = vpop.permute.xlu2 %2132 }
 0x7e3   :  { %v2134_v35 = vunpack.i.l.bf16 %v2133_v47  ;;  %v2135_v57 = vunpack.i.h.bf16 %v2133_v47 }
 0x7e4   :  { %2204 = vpow2.f32 %v1394_v40 }
 0x7e5   :  { %v2988_v41 = vpop.eup %2202  ;;  %2206 = vpow2.f32 %v1380_v58 }
 0x7e6   :  { %v1414_v42 = vsel %vm317_vm1, %v2988_v41, 0.0 }
 0x7e7   :  { %1415 = vadd.xlane.f32.xlu1 %v1414_v42 }
 0x7ea   :  { %v2992_v43 = vpop.eup %2204 }
 0x7eb   :  { %v1417_v44 = vsel %vm317_vm1, %v2992_v43, 0.0  ;;  %v3000_v53 = vpop.eup %2206 }
 0x7ec   :  { %1418 = vadd.xlane.f32.xlu0 %v1417_v44  ;;  %v1396_v13 = vsel %vm317_vm1, %v3000_v53, 0.0 }
 0x7ed   :  { %v2128_v46 = vpop.permute.xlu1 %2127 }
 0x7ee   :  { %v2129_v48 = vunpack.i.l.bf16 %v2128_v46  ;;  %v2130_v10 = vunpack.i.h.bf16 %v2128_v46 }
 0x7f0   :  { %v2141_v50 = vpack.i.bf16 %v2134_v35, %v2129_v48 }
 0x7f2   :  { %v2138_v49 = vpop.permute.xlu0 %2137 }
 0x7f3   :  { %v2140_v51 = vunpack.i.h.bf16 %v2138_v49  ;;  %v2139_v55 = vunpack.i.l.bf16 %v2138_v49 }
 0x7f5   :  { %v2151_v62 = vpack.i.bf16 %v2140_v51, %v2135_v57  ;;  %v2146_v39 = vpack.i.bf16 %v2130_v10, %v2139_v55 }
 0x7fa   :  { %2142 = vrot.lane.b32.xlu2 %v2141_v50, %s2506_s6 }
 0x800   :  { %2152 = vrot.lane.b32.xlu0 %v2151_v62, %s2506_s6  ;;  %2147 = vrot.lane.b32.xlu1 %v2146_v39, %s2506_s6 }
 0x808   :  { %1540 = vrot.lane.b32.xlu1 %v2858_v52, %s2506_s6 }
 0x810   :  { %1644 = vrot.lane.b32.xlu1 %v2864_v54, %s2506_s6 }
 0x818   :  { %v1362_v7 = vpop.xlane.xlu1 %1361 }
 0x819   :  { %v1376_v8 = vsub.f32 %v2968_v2, %v1362_v7 }
 0x81b   :  { %v1388_v11 = vmul.f32 1.442695, %v1376_v8 }
 0x81d   :  { %2208 = vpow2.f32 %v1388_v11 }
 0x823   :  { %1397 = vadd.xlane.f32.xlu2 %v1396_v13  ;;  %v3004_v60 = vpop.eup %2208 }
 0x824   :  { %v1408_v52 = vsel %vm317_vm1, %v3004_v60, 0.0 }
 0x82a   :  { %1409 = vadd.xlane.f32.xlu0 %v1408_v52 }
 0x82e   :  { %v1401_v54 = vpop.xlane.xlu2 %1400 }
 0x82f   :  { %2210 = vrcp.f32 %v1401_v54  ;;  %vm1440_vm3 = vweird.f32 %v1401_v54  ;;  %v1446_v9 = vand.u32 2147483648, %v1401_v54  ;;  %v1444_v30 = vand.u32 2147483647, %v1401_v54 }
 0x831   :  { %v1447_v33 = vor.u32 1.1754944e-38, %v1446_v9  ;;  %vm1445_vm9 = vcmp.eq.f32.partialorder %v1444_v30, 8.507059e+37 }
 0x835   :  { %v2211_v45 = vpop.eup %2210 }
 0x836   :  { %v1436_v0 = vmul.f32 %v2211_v45, %v1401_v54  ;;  %v3008_v17 = vpop.xlane.xlu1 %1406  ;;  %vm1441_vm15 = vweird.f32 %v2211_v45 }
 0x837   :  { %vm3014_vm4 = vmor %vm1440_vm3, %vm1441_vm15  ;;  %vm1470_vm12 = vweird.f32 %v3008_v17  ;;  %v1476_v58 = vand.u32 2147483648, %v3008_v17  ;;  %v1474_v13 = vand.u32 2147483647, %v3008_v17 }
 0x838   :  { %v1437_v61 = vsub.f32 1.0, %v1436_v0 }
 0x83a   :  { %v1438_v16 = vmul.f32 %v2211_v45, %v1437_v61 }
 0x83c   :  { %v1439_v18 = vadd.f32 %v2211_v45, %v1438_v16 }
 0x83e   :  { %v1443_v56 = vsel %vm3014_vm4, %v2211_v45, %v1439_v18 }
 0x83f   :  { %v1448_v25 = vsel %vm1445_vm9, %v1447_v33, %v1443_v56 }
 0x840   :  { %v1449_v47 = vmul.f32 %v2972_v20, %v1448_v25 }
 0x846   :  { %v1404_v63 = vpop.xlane.xlu0 %1403 }
 0x847   :  { %2212 = vrcp.f32 %v1404_v63  ;;  %v1461_v28 = vand.u32 2147483648, %v1404_v63  ;;  %vm1455_vm5 = vweird.f32 %v1404_v63  ;;  %v1459_v31 = vand.u32 2147483647, %v1404_v63 }
 0x848   :  { %2214 = vrcp.f32 %v3008_v17 }
 0x849   :  { %v1462_v34 = vor.u32 1.1754944e-38, %v1461_v28  ;;  %vm1460_vm10 = vcmp.eq.f32.partialorder %v1459_v31, 8.507059e+37 }
 0x84d   :  { %v2213_v1 = vpop.eup %2212 }
 0x84e   :  { %v1451_v2 = vmul.f32 %v2213_v1, %v1404_v63  ;;  %vm1456_vm2 = vweird.f32 %v2213_v1  ;;  %v2215_v24 = vpop.eup %2214 }
 0x84f   :  { %vm1457_vm8 = vmor %vm1455_vm5, %vm1456_vm2  ;;  %v1466_v38 = vmul.f32 %v2215_v24, %v3008_v17  ;;  %vm1471_vm11 = vweird.f32 %v2215_v24 }
 0x850   :  { %v1452_v3 = vsub.f32 1.0, %v1451_v2  ;;  %vm3035_vm15 = vmor %vm1470_vm12, %vm1471_vm11  ;;  %v1477_v2 = vor.u32 1.1754944e-38, %v1476_v58 }
 0x851   :  { %v1467_v49 = vsub.f32 1.0, %v1466_v38 }
 0x852   :  { %v1453_v15 = vmul.f32 %v2213_v1, %v1452_v3 }
 0x853   :  { %v1468_v10 = vmul.f32 %v2215_v24, %v1467_v49 }
 0x854   :  { %v1454_v19 = vadd.f32 %v2213_v1, %v1453_v15 }
 0x855   :  { %v3011_v6 = vpop.xlane.xlu2 %1412  ;;  %v1469_v39 = vadd.f32 %v2215_v24, %v1468_v10 }
 0x856   :  { %2216 = vrcp.f32 %v3011_v6  ;;  %v1458_v59 = vsel %vm1457_vm8, %v2213_v1, %v1454_v19  ;;  %vm1500_vm2 = vweird.f32 %v3011_v6  ;;  %v1506_v52 = vand.u32 2147483648, %v3011_v6 }
 0x857   :  { %v1463_v27 = vsel %vm1460_vm10, %v1462_v34, %v1458_v59  ;;  %v1504_v63 = vand.u32 2147483647, %v3011_v6  ;;  %v1473_v1 = vsel %vm3035_vm15, %v2215_v24, %v1469_v39  ;;  %vm1475_vm8 = vcmp.eq.f32.partialorder %v1474_v13, 8.507059e+37 }
 0x858   :  { %v1464_v48 = vmul.f32 %v2980_v32, %v1463_v27  ;;  %v1507_v17 = vor.u32 1.1754944e-38, %v1506_v52  ;;  %v1478_v18 = vsel %vm1475_vm8, %v1477_v2, %v1473_v1  ;;  %v1095_v1 = vld [vmem:[#allocation13 + $0x8] sm:$0xff] }
 0x859   :  { %vm1505_vm9 = vcmp.eq.f32.partialorder %v1504_v63, 8.507059e+37 }
 0x85a   :  { %v1416_v36 = vpop.xlane.xlu1 %1415 }
 0x85b   :  { %2218 = vrcp.f32 %v1416_v36  ;;  %v1521_v54 = vand.u32 2147483648, %v1416_v36  ;;  %vm1515_vm4 = vweird.f32 %v1416_v36  ;;  %v1519_v0 = vand.u32 2147483647, %v1416_v36 }
 0x85c   :  { %v2217_v4 = vpop.eup %2216 }
 0x85d   :  { %v2143_v5 = vpop.permute.xlu2 %2142  ;;  %v1496_v44 = vmul.f32 %v2217_v4, %v3011_v6  ;;  %vm1501_vm13 = vweird.f32 %v2217_v4  ;;  %v1522_v15 = vor.u32 1.1754944e-38, %v1521_v54  ;;  %vm1520_vm10 = vcmp.eq.f32.partialorder %v1519_v0, 8.507059e+37  ;;  %v1096_v0 = vld [vmem:[#allocation13 + $0x10] sm:$0xff] }
 0x85e   :  { %v2145_v40 = vunpack.i.h.bf16 %v2143_v5  ;;  %v2144_v42 = vunpack.i.l.bf16 %v2143_v5  ;;  %vm3042_vm3 = vmor %vm1500_vm2, %vm1501_vm13 }
 0x85f   :  { %v3022_v46 = vpop.xlane.xlu0 %1418  ;;  %v1497_v51 = vsub.f32 1.0, %v1496_v44 }
 0x860   :  { %2220 = vrcp.f32 %v3022_v46  ;;  %1587 = vmatpush.msrb.mxu3 %v2144_v42  ;;  %1613 = vmatpush.msrb.mxu0 %v2145_v40  ;;  %v1536_v30 = vand.u32 2147483648, %v3022_v46  ;;  %vm1530_vm12 = vweird.f32 %v3022_v46  ;;  %v1534_v33 = vand.u32 2147483647, %v3022_v46 }
 0x861   :  { %v2219_v35 = vpop.eup %2218  ;;  %2073 = vmatmul.msk.f32.vlgmr.msrb.gmra.mxu3 %vm317_vm1, %v1449_v47  ;;  %2074 = vmatmul.msk.f32.vlgmr.msrb.gmra.mxu0 %vm317_vm1, %v1464_v48  ;;  %v1498_v62 = vmul.f32 %v2217_v4, %v1497_v51 }
 0x862   :  { %v1511_v50 = vmul.f32 %v2219_v35, %v1416_v36  ;;  %vm1516_vm14 = vweird.f32 %v2219_v35  ;;  %v1479_v36 = vmul.f32 %v2976_v26, %v1478_v18  ;;  %v1537_v27 = vor.u32 1.1754944e-38, %v1536_v30 }
 0x863   :  { %v1499_v7 = vadd.f32 %v2217_v4, %v1498_v62  ;;  %vm1517_vm5 = vmor %vm1515_vm4, %vm1516_vm14  ;;  %vm1535_vm14 = vcmp.eq.f32.partialorder %v1534_v33, 8.507059e+37 }
 0x864   :  { %v1512_v55 = vsub.f32 1.0, %v1511_v50 }
 0x865   :  { %v1503_v3 = vsel %vm3042_vm3, %v2217_v4, %v1499_v7 }
 0x866   :  { %v3029_v57 = vpop.eup %2220  ;;  %v1513_v20 = vmul.f32 %v2219_v35, %v1512_v55  ;;  %v1508_v19 = vsel %vm1505_vm9, %v1507_v17, %v1503_v3 }
 0x867   :  { %v1526_v32 = vmul.f32 %v3029_v57, %v3022_v46  ;;  %vm1531_vm11 = vweird.f32 %v3029_v57  ;;  %v1509_v24 = vmul.f32 %v2984_v37, %v1508_v19 }
 0x868   :  { %v1514_v8 = vadd.f32 %v2219_v35, %v1513_v20  ;;  %vm1532_vm13 = vmor %vm1530_vm12, %vm1531_vm11 }
 0x869   :  { %v1527_v12 = vsub.f32 1.0, %v1526_v32 }
 0x86a   :  { %v1518_v16 = vsel %vm1517_vm5, %v2219_v35, %v1514_v8 }
 0x86b   :  { %v1528_v61 = vmul.f32 %v3029_v57, %v1527_v12  ;;  %v1523_v6 = vsel %vm1520_vm10, %v1522_v15, %v1518_v16 }
 0x86c   :  { %v1524_v4 = vmul.f32 %v2988_v41, %v1523_v6 }
 0x86d   :  { %v1529_v9 = vadd.f32 %v3029_v57, %v1528_v61  ;;  %v1094_v61 = vld [vmem:[#allocation13] sm:$0xff] }
 0x86f   :  { %v1533_v25 = vsel %vm1532_vm13, %v3029_v57, %v1529_v9 }
 0x870   :  { %v1538_v26 = vsel %vm1535_vm14, %v1537_v27, %v1533_v25  ;;  %vm1905_vm14 = vcmask 523264  }
 0x871   :  { %v1539_v38 = vmul.f32 %v2992_v43, %v1538_v26 }
 0x872   :  { %v2153_v28 = vpop.permute.xlu0 %2152  ;;  %v2148_v29 = vpop.permute.xlu1 %2147 }
 0x873   :  { %v2154_v31 = vunpack.i.l.bf16 %v2153_v28  ;;  %v2150_v56 = vunpack.i.h.bf16 %v2148_v29  ;;  %v2149_v59 = vunpack.i.l.bf16 %v2148_v29  ;;  %v2155_v34 = vunpack.i.h.bf16 %v2153_v28 }
 0x875   :  { %1639 = vmatpush.msra.mxu1 %v2149_v59  ;;  %1691 = vmatpush.msra.mxu3 %v2150_v56  ;;  %v1778_v59 = vperm.slane %v2896_v22, 3 }
 0x876   :  { %1717 = vmatpush.msra.mxu0 %v2154_v31  ;;  %2075 = vmatmul.msk.f32.vlgmr.msra.gmra.mxu1 %vm317_vm1, %v1479_v36 }
 0x877   :  { %2077 = vmatmul.msk.f32.vlgmr.msra.gmra.mxu3 %vm317_vm1, %v1509_v24  ;;  %2078 = vmatmul.msk.f32.vlgmr.msra.gmra.mxu0 %vm317_vm1, %v1524_v4 }
 0x878   :  { %1743 = vmatpush.msrb.mxu1 %v2155_v34 }
 0x87a   :  { %v1541_v5 = vpop.permute.xlu1 %1540 }
 0x87b   :  { %1561 = vmatpush.msrb.mxu2 %v1541_v5 }
 0x87e   :  { %2079 = vmatmul.msk.f32.vlgmr.msrb.gmra.mxu1 %vm317_vm1, %v1539_v38 }
 0x882   :  { %v1645_v37 = vpop.permute.xlu1 %1644 }
 0x883   :  { %1665 = vmatpush.msra.mxu2 %v1645_v37 }
 0x896   :  { %v1398_v41 = vpop.xlane.xlu2 %1397 }
 0x897   :  { %2222 = vrcp.f32 %v1398_v41  ;;  %v1431_v47 = vand.u32 2147483648, %v1398_v41  ;;  %v1429_v35 = vand.u32 2147483647, %v1398_v41  ;;  %vm1425_vm2 = vweird.f32 %v1398_v41 }
 0x899   :  { %v1432_v43 = vor.u32 1.1754944e-38, %v1431_v47  ;;  %vm1430_vm4 = vcmp.eq.f32.partialorder %v1429_v35, 8.507059e+37  ;;  %v1861_v35 = vld [vmem:[#allocation14 + $0x8] sm:$0xff] }
 0x89d   :  { %v2223_v40 = vpop.eup %2222  ;;  %v1410_v42 = vpop.xlane.xlu0 %1409 }
 0x89e   :  { %v1421_v44 = vmul.f32 %v2223_v40, %v1398_v41  ;;  %2224 = vrcp.f32 %v1410_v42  ;;  %vm1426_vm15 = vweird.f32 %v2223_v40  ;;  %v1491_v62 = vand.u32 2147483648, %v1410_v42 }
 0x89f   :  { %vm1427_vm3 = vmor %vm1425_vm2, %vm1426_vm15  ;;  %v1489_v39 = vand.u32 2147483647, %v1410_v42  ;;  %vm1485_vm8 = vweird.f32 %v1410_v42 }
 0x8a0   :  { %v1422_v46 = vsub.f32 1.0, %v1421_v44  ;;  %v1492_v58 = vor.u32 1.1754944e-38, %v1491_v62 }
 0x8a1   :  { %vm1490_vm10 = vcmp.eq.f32.partialorder %v1489_v39, 8.507059e+37 }
 0x8a2   :  { %v1423_v48 = vmul.f32 %v2223_v40, %v1422_v46 }
 0x8a4   :  { %v2225_v49 = vpop.eup %2224  ;;  %v1424_v50 = vadd.f32 %v2223_v40, %v1423_v48  ;;  %v1862_v48 = vld [vmem:[#allocation14 + $0x10] sm:$0xff] }
 0x8a5   :  { %v1481_v51 = vmul.f32 %v2225_v49, %v1410_v42  ;;  %vm1486_vm5 = vweird.f32 %v2225_v49 }
 0x8a6   :  { %v1428_v55 = vsel %vm1427_vm3, %v2223_v40, %v1424_v50  ;;  %vm1487_vm9 = vmor %vm1485_vm8, %vm1486_vm5 }
 0x8a7   :  { %v1433_v57 = vsel %vm1430_vm4, %v1432_v43, %v1428_v55  ;;  %v1482_v10 = vsub.f32 1.0, %v1481_v51  ;;  %v1903_v55 = vld [vmem:[%s3149_s10 + $0x38] sm:$0xff] }
 0x8a8   :  { %v1434_v20 = vmul.f32 %v3000_v53, %v1433_v57  ;;  %v1902_v57 = vld [vmem:[%s3149_s10 + $0x30] sm:$0xff]  ;;  %1920 = vmatpush.msrb.mxu0 %v1903_v55 }
 0x8a9   :  { %v1483_v32 = vmul.f32 %v2225_v49, %v1482_v10  ;;  %v1901_v10 = vld [vmem:[%s3149_s10 + $0x28] sm:$0xff] }
 0x8aa   :  { %2072 = vmatmul.msk.f32.vlgmr.msrb.gmra.mxu2 %vm317_vm1, %v1434_v20  ;;  %1921 = vmatpush.msrb.mxu0 %v1902_v57 }
 0x8ab   :  { %v1484_v12 = vadd.f32 %v2225_v49, %v1483_v32  ;;  %v1900_v32 = vld [vmem:[%s3149_s10 + $0x20] sm:$0xff] }
 0x8ac   :  { %1922 = vmatpush.msrb.mxu0 %v1901_v10 }
 0x8ad   :  { %v1488_v7 = vsel %vm1487_vm9, %v2225_v49, %v1484_v12  ;;  %v1860_v49 = vld [vmem:[#allocation14] sm:$0xff] }
 0x8ae   :  { %v1493_v8 = vsel %vm1490_vm10, %v1492_v58, %v1488_v7  ;;  %v1899_v58 = vld [vmem:[%s3149_s10 + $0x18] sm:$0xff]  ;;  %1923 = vmatpush.msrb.mxu0 %v1900_v32 }
 0x8af   :  { %v1494_v11 = vmul.f32 %v3004_v60, %v1493_v8  ;;  %v1097_v60 = vld [vmem:[#allocation13 + $0x18] sm:$0xff] }
 0x8b0   :  { %1797 = vmatpush.msrb.mxu2 %v1097_v60  ;;  %1924 = vmatpush.msrb.mxu0 %v1899_v58 }
 0x8b2   :  { %2076 = vmatmul.msk.f32.vlgmr.msra.gmra.mxu2 %vm317_vm1, %v1494_v11 }
 0x8b3   :  { %1798 = vmatpush.msrb.mxu2 %v1096_v0 }
 0x8b5   :  { %1799 = vmatpush.msrb.mxu2 %v1095_v1  ;;  %v1857_v1 = vperm.slane %v2896_v22, 5 }
 0x8b7   :  { %1800 = vmatpush.msrb.mxu2 %v1094_v61 }
 0x8de   :  { %v1615_v13 = vpop.f32.mrf.mxu0 }
 0x8df   :  { %1758 = vrot.lane.b32.xlu1 %v1615_v13, %s2503_s9 }
 0x8e4   :  { %v1589_v53 = vpop.f32.mrf.mxu3 }
 0x8e7   :  { %1750 = vrot.lane.b32.xlu1 %v1589_v53, %s2489_s30 }
 0x8f3   :  { %v1641_v52 = vpop.f32.mrf.mxu1 }
 0x8f4   :  { %v1719_v54 = vpop.f32.mrf.mxu0  ;;  %1766 = vrot.lane.b32.xlu1 %v1641_v52, %s2504_s25 }
 0x8f5   :  { %1760 = vrot.lane.b32.xlu0 %v1719_v54, %s2503_s9 }
 0x8fa   :  { %v1693_v45 = vpop.f32.mrf.mxu3 }
 0x8fb   :  { %1752 = vrot.lane.b32.xlu2 %v1693_v45, %s2489_s30  ;;  %v1745_v63 = vpop.f32.mrf.mxu1  ;;  %v1854_v45 = vperm.slane %v2896_v22, 4  ;;  %v1898_v22 = vld [vmem:[%s3149_s10 + $0x10] sm:$0xff] }
 0x8fc   :  { %1768 = vrot.lane.b32.xlu1 %v1745_v63, %s2504_s25  ;;  %1925 = vmatpush.msrb.mxu0 %v1898_v22 }
 0x92d   :  { %v1563_v16 = vpop.f32.mrf.mxu2 }
 0x935   :  { %v1667_v28 = vpop.f32.mrf.mxu2 }
 0x951   :  { %v1759_v2 = vpop.permute.xlu1 %1758 }
 0x955   :  { %v1753_v6 = vpop.permute.xlu2 %1752 }
 0x956   :  { %v1773_v29 = vsel %vm317_vm1, %v1667_v28, %v1753_v6  ;;  %v1896_v28 = vld [vmem:[%s3149_s10] sm:$0xff] }
 0x959   :  { %v1751_v3 = vpop.permute.xlu1 %1750 }
 0x95a   :  { %v1772_v17 = vsel %vm317_vm1, %v1563_v16, %v1751_v3 }
 0x95b   :  { %v1774_v15 = vsel %vm966_vm6, %v1772_v17, %v1759_v2 }
 0x966   :  { %v1767_v18 = vpop.permute.xlu1 %1766 }
 0x967   :  { %v1776_v19 = vsel %vm969_vm7, %v1774_v15, %v1767_v18  ;;  %v1761_v9 = vpop.permute.xlu0 %1760 }
 0x968   :  { %2080 = vmatmul.msk.f32.vlgmr.msrb.gmra.mxu2 %vm214_vm0, %v1776_v19  ;;  %v1775_v30 = vsel %vm966_vm6, %v1773_v29, %v1761_v9  ;;  %v1897_v9 = vld [vmem:[%s3149_s10 + $0x8] sm:$0xff]  ;;  %v2234_v29 = vld [vmem:[#allocation16] sm:$0xff]  ;;  %s2507_s10 = smov [#allocation17]  }
 0x969   :  { %1926 = vmatpush.msrb.mxu0 %v1897_v9  ;;  %s1993_s5 = sshll.u32 %s2507_s10, 4  ;;  %s1994_s5 = int_to_ptr.vmem [resolvable:$true] %s1993_s5 }
 0x96b   :  { %1927 = vmatpush.msrb.mxu0 %v1896_v28 }
 0x96e   :  { %v1769_v31 = vpop.permute.xlu1 %1768 }
 0x96f   :  { %v1777_v56 = vsel %vm969_vm7, %v1775_v30, %v1769_v31  ;;  %v1864_v30 = vperm.slane %v2234_v29, 6 }
 0x970   :  { %2081 = vmatmul.msk.f32.gmra.mxu2 %vm214_vm0, %v1777_v56 }
 0x9eb   :  { %v1802_v33 = vpop.f32.mrf.mxu2 }
 0x9ec   :  { %v1803_v34 = vadd.f32 %v1802_v33, %v1778_v59 }
 0x9ee   :  { %v1808_v36 = vadd.f32 %v1803_v34, %v2922_v14 }
 0x9f0   :  { %v1810_v24 = vsel %vm214_vm0, %v1808_v36, 0.0 }
 0x9f1   :  { %1811 = vadd.xlane.f32.xlu1 %v1810_v24  ;;  %v1904_v24 = vperm.slane %v2234_v29, 7 }
 0x9f3   :  { %v1805_v4 = vpop.f32.mrf.mxu2 }
 0x9f4   :  { %v1806_v25 = vadd.f32 %v1805_v4, %v1778_v59 }
 0x9f6   :  { %v1809_v27 = vadd.f32 %v1806_v25, %v2927_v23  ;;  %v1863_v23 = vld [vmem:[#allocation14 + $0x18] sm:$0xff] }
 0x9f7   :  { %1883 = vmatpush.msrb.mxu3 %v1863_v23 }
 0x9f8   :  { %v1813_v26 = vsel %vm214_vm0, %v1809_v27, 0.0 }
 0x9f9   :  { %1814 = vadd.xlane.f32.xlu2 %v1813_v26  ;;  %1884 = vmatpush.msrb.mxu3 %v1862_v48 }
 0x9fb   :  { %1885 = vmatpush.msrb.mxu3 %v1861_v35 }
 0x9fd   :  { %1886 = vmatpush.msrb.mxu3 %v1860_v49 }
 0xa64   :  { %v1812_v5 = vpop.xlane.xlu1 %1811 }
 0xa65   :  { %v1816_v38 = vmul.f32 %v1812_v5, %v2905_v21 }
 0xa67   :  { %v1818_v37 = vsub.f32 %v1808_v36, %v1816_v38 }
 0xa69   :  { %v1820_v41 = vmul.f32 %v1818_v37, %v1818_v37 }
 0xa6b   :  { %v1822_v40 = vsel %vm214_vm0, %v1820_v41, 0.0 }
 0xa6c   :  { %1823 = vadd.xlane.f32.xlu0 %v1822_v40  ;;  %v1815_v42 = vpop.xlane.xlu2 %1814 }
 0xa6d   :  { %v1817_v14 = vmul.f32 %v1815_v42, %v2905_v21 }
 0xa6f   :  { %v1819_v44 = vsub.f32 %v1809_v27, %v1817_v14 }
 0xa71   :  { %v1821_v46 = vmul.f32 %v1819_v44, %v1819_v44 }
 0xa73   :  { %v1825_v47 = vsel %vm214_vm0, %v1821_v46, 0.0 }
 0xa74   :  { %1826 = vadd.xlane.f32.xlu1 %v1825_v47 }
 0xadf   :  { %v1824_v50 = vpop.xlane.xlu0 %1823 }
 0xae0   :  { %v1828_v43 = vmul.f32 %v1824_v50, %v2905_v21 }
 0xae2   :  { %v1830_v51 = vadd.f32 1e-05, %v1828_v43 }
 0xae4   :  { %2226 = vrsqrt.f32 %v1830_v51  ;;  %vm1838_vm6 = vweird.f32 %v1830_v51 }
 0xae7   :  { %v1827_v62 = vpop.xlane.xlu1 %1826 }
 0xae8   :  { %v1829_v20 = vmul.f32 %v1827_v62, %v2905_v21 }
 0xaea   :  { %v2227_v39 = vpop.eup %2226  ;;  %v1831_v12 = vadd.f32 1e-05, %v1829_v20 }
 0xaeb   :  { %v1833_v7 = vmul.f32 %v2227_v39, %v1830_v51  ;;  %vm1839_vm1 = vweird.f32 %v2227_v39 }
 0xaec   :  { %2228 = vrsqrt.f32 %v1831_v12  ;;  %vm1840_vm7 = vmor %vm1838_vm6, %vm1839_vm1  ;;  %vm1848_vm12 = vweird.f32 %v1831_v12 }
 0xaed   :  { %v1834_v8 = vmul.f32 %v2227_v39, %v1833_v7 }
 0xaef   :  { %v1835_v11 = vmul.f32 0.5, %v1834_v8 }
 0xaf1   :  { %v1836_v13 = vsub.f32 1.5, %v1835_v11 }
 0xaf2   :  { %v2229_v53 = vpop.eup %2228 }
 0xaf3   :  { %v1837_v52 = vmul.f32 %v2227_v39, %v1836_v13  ;;  %v1843_v54 = vmul.f32 %v2229_v53, %v1831_v12  ;;  %vm1849_vm11 = vweird.f32 %v2229_v53  ;;  %v189_v12 = vld [vmem:[#allocation16 + $0x8] sm:$0x3] }
 0xaf4   :  { %vm1850_vm13 = vmor %vm1848_vm12, %vm1849_vm11  ;;  %v1981_v13 = vperm.slane %v189_v12, 0 }
 0xaf5   :  { %v1841_v63 = vsel %vm1840_vm7, %v2227_v39, %v1837_v52  ;;  %v1844_v60 = vmul.f32 %v2229_v53, %v1843_v54 }
 0xaf6   :  { %v1852_v0 = vmul.f32 %v1841_v63, %v1818_v37 }
 0xaf7   :  { %v1845_v61 = vmul.f32 0.5, %v1844_v60 }
 0xaf8   :  { %v1855_v2 = vmul.f32 %v1854_v45, %v1852_v0 }
 0xaf9   :  { %v1846_v3 = vsub.f32 1.5, %v1845_v61 }
 0xafa   :  { %v1858_v16 = vadd.f32 %v1857_v1, %v1855_v2 }
 0xafb   :  { %v1847_v17 = vmul.f32 %v2229_v53, %v1846_v3 }
 0xafc   :  { %2082 = vmatmul.msk.f32.vlgmr.msrb.gmra.mxu3 %vm214_vm0, %v1858_v16 }
 0xafd   :  { %v1851_v15 = vsel %vm1850_vm13, %v2229_v53, %v1847_v17 }
 0xafe   :  { %v1853_v18 = vmul.f32 %v1851_v15, %v1819_v44 }
 0xb00   :  { %v1856_v19 = vmul.f32 %v1854_v45, %v1853_v18  ;;  %v1984_v45 = vperm.slane %v189_v12, 1 }
 0xb02   :  { %v1859_v6 = vadd.f32 %v1857_v1, %v1856_v19 }
 0xb04   :  { %2083 = vmatmul.msk.f32.gmra.mxu3 %vm214_vm0, %v1859_v6 }
 0xb7f   :  { %v1888_v31 = vpop.f32.mrf.mxu3 }
 0xb80   :  { %v1889_v56 = vadd.f32 %v1888_v31, %v1864_v30 }
 0xb82   :  { %v1894_v59 = vmax.f32 %v1889_v56, 0.0 }
 0xb84   :  { %2084 = vmatmul.msk.f32.vlgmr.msrb.gmra.mxu0 %vm1905_vm14, %v1894_v59 }
 0xb87   :  { %v1891_v33 = vpop.f32.mrf.mxu3 }
 0xb88   :  { %v1892_v34 = vadd.f32 %v1891_v33, %v1864_v30 }
 0xb8a   :  { %v1895_v36 = vmax.f32 %v1892_v34, 0.0 }
 0xb8c   :  { %2085 = vmatmul.msk.f32.gmra.mxu0 %vm1905_vm14, %v1895_v36 }
 0xc01   :  { %v1929_v4 = vpop.f32.mrf.mxu0 }
 0xc02   :  { %v1930_v25 = vadd.f32 %v1929_v4, %v1904_v24 }
 0xc04   :  { %v1935_v27 = vadd.f32 %v1930_v25, %v1858_v16 }
 0xc06   :  { %v1937_v26 = vsel %vm214_vm0, %v1935_v27, 0.0 }
 0xc07   :  { %1938 = vadd.xlane.f32.xlu1 %v1937_v26 }
 0xc09   :  { %v1932_v5 = vpop.f32.mrf.mxu0 }
 0xc0a   :  { %v1933_v38 = vadd.f32 %v1932_v5, %v1904_v24 }
 0xc0c   :  { %v1936_v37 = vadd.f32 %v1933_v38, %v1859_v6 }
 0xc0e   :  { %v1940_v41 = vsel %vm214_vm0, %v1936_v37, 0.0 }
 0xc0f   :  { %1941 = vadd.xlane.f32.xlu2 %v1940_v41 }
 0xc7a   :  { %v1939_v40 = vpop.xlane.xlu1 %1938 }
 0xc7b   :  { %v1943_v42 = vmul.f32 %v1939_v40, %v2905_v21 }
 0xc7d   :  { %v1945_v14 = vsub.f32 %v1935_v27, %v1943_v42 }
 0xc7f   :  { %v1947_v44 = vmul.f32 %v1945_v14, %v1945_v14 }
 0xc81   :  { %v1949_v46 = vsel %vm214_vm0, %v1947_v44, 0.0 }
 0xc82   :  { %v1942_v47 = vpop.xlane.xlu2 %1941  ;;  %1950 = vadd.xlane.f32.xlu0 %v1949_v46 }
 0xc83   :  { %v1944_v23 = vmul.f32 %v1942_v47, %v2905_v21 }
 0xc85   :  { %v1946_v48 = vsub.f32 %v1936_v37, %v1944_v23 }
 0xc87   :  { %v1948_v35 = vmul.f32 %v1946_v48, %v1946_v48 }
 0xc89   :  { %v1952_v49 = vsel %vm214_vm0, %v1948_v35, 0.0 }
 0xc8a   :  { %1953 = vadd.xlane.f32.xlu1 %v1952_v49 }
 0xcf5   :  { %v1951_v50 = vpop.xlane.xlu0 %1950 }
 0xcf6   :  { %v1955_v43 = vmul.f32 %v1951_v50, %v2905_v21 }
 0xcf8   :  { %v1957_v51 = vadd.f32 1e-05, %v1955_v43 }
 0xcfa   :  { %2230 = vrsqrt.f32 %v1957_v51  ;;  %vm1965_vm2 = vweird.f32 %v1957_v51 }
 0xcfd   :  { %v1954_v55 = vpop.xlane.xlu1 %1953 }
 0xcfe   :  { %v1956_v57 = vmul.f32 %v1954_v55, %v2905_v21 }
 0xd00   :  { %v2231_v10 = vpop.eup %2230  ;;  %v1958_v62 = vadd.f32 1e-05, %v1956_v57 }
 0xd01   :  { %v1960_v20 = vmul.f32 %v2231_v10, %v1957_v51  ;;  %vm1966_vm15 = vweird.f32 %v2231_v10 }
 0xd02   :  { %2232 = vrsqrt.f32 %v1958_v62  ;;  %vm1967_vm3 = vmor %vm1965_vm2, %vm1966_vm15  ;;  %vm1975_vm5 = vweird.f32 %v1958_v62 }
 0xd03   :  { %v1961_v32 = vmul.f32 %v2231_v10, %v1960_v20 }
 0xd05   :  { %v1962_v39 = vmul.f32 0.5, %v1961_v32 }
 0xd07   :  { %v1963_v58 = vsub.f32 1.5, %v1962_v39 }
 0xd08   :  { %v2233_v7 = vpop.eup %2232 }
 0xd09   :  { %v1964_v8 = vmul.f32 %v2231_v10, %v1963_v58  ;;  %v1970_v11 = vmul.f32 %v2233_v7, %v1958_v62  ;;  %vm1976_vm4 = vweird.f32 %v2233_v7 }
 0xd0a   :  { %vm1977_vm8 = vmor %vm1975_vm5, %vm1976_vm4 }
 0xd0b   :  { %v1968_v53 = vsel %vm1967_vm3, %v2231_v10, %v1964_v8  ;;  %v1971_v52 = vmul.f32 %v2233_v7, %v1970_v11 }
 0xd0c   :  { %v1979_v54 = vmul.f32 %v1968_v53, %v1945_v14 }
 0xd0d   :  { %v1972_v21 = vmul.f32 0.5, %v1971_v52 }
 0xd0e   :  { %v1982_v63 = vmul.f32 %v1981_v13, %v1979_v54 }
 0xd0f   :  { %v1973_v60 = vsub.f32 1.5, %v1972_v21 }
 0xd10   :  { %v1985_v0 = vadd.f32 %v1984_v45, %v1982_v63 }
 0xd11   :  { %v1974_v1 = vmul.f32 %v2233_v7, %v1973_v60 }
 0xd12   :  { %1987 = vst.msk [vmem:[#allocation17] sm:$0xff] %vm214_vm0, %v1985_v0 }
 0xd13   :  { %v1978_v61 = vsel %vm1977_vm8, %v2233_v7, %v1974_v1 }
 0xd14   :  { %v1980_v2 = vmul.f32 %v1978_v61, %v1946_v48 }
 0xd16   :  { %v1983_v3 = vmul.f32 %v1981_v13, %v1980_v2 }
 0xd18   :  { %v1986_v16 = vadd.f32 %v1984_v45, %v1983_v3 }
 0xd1a   :  { %1988 = vst.msk [vmem:[#allocation17 + $0x8] sm:$0xff] %vm214_vm0, %v1986_v16 }
 0xd1b   :  { %2001 = dma.vmem_to_hbm [thread:$0]  %s1994_s5, 256, %s1996_s8, [#allocation4], %s2488_s29, %s2488_s29, %s2489_s30  }
 0xd1c   :  { %2485 = dma.done.wait [#allocation4], 256  }
 0xd1d   :  { %2486 = vsyncadd [#allocation4], 4294967040 }
 0xd1e   :  { %2006 = vsyncpa [#allocation3], 1 }
 0xd1f   :  { %2007 = vsyncpa [#allocation6], 1 }
 0xd20   :  { %2008 = vsyncpa [#allocation9], 1 }
 0xd21   :  { %2009 = vsyncpa [#allocation12], 1 }
 0xd22   :  { %2010 = vsyncpa [#allocation15], 1 }
 0xd23   :  { %2011 = vsyncpa [#allocation4], 1 }

</bundles_post_ra>
